<compile_context>
chip_gen: v6e
topology: v6e:2x2x1
jax: 0.10.0
libtpu: 0.0.40
codegen_flags: <defaults>
</compile_context>

<pallas_src>
import math

import jax
import jax.numpy as jnp
from jax import lax
from jax.experimental import pallas as pl
from jax.experimental.pallas import tpu as pltpu

# ----------------------------- configuration -----------------------------
B = 2            # batch
S = 8            # sequence length
H = 32           # gpt hidden dim (stands in for 768)
NH = 4           # attention heads
DH = H // NH     # head dim
LAYERS = 2       # transformer layers
VOCAB = 64
MAXPOS = 16
LOGITS_DIM = 16                    # side-network logits dim
HALF_LOGITS = LOGITS_DIM // 2      # after logits_hidden_layer
GH = HALF_LOGITS                   # gpt_head_num_neurons (defaults to logits_dim//2)
NUM_OUT = 1                        # num_output_neurons
LN_EPS = 1e-5

OUT_ROWS, OUT_LANES = 8, 128       # lane-dense packed output slab


# ----------------------------- fused Pallas kernel -----------------------------
def _fused_kernel(idx_ref, mask_ref, logits_ref, y_ref,
                  emb_ref, ln_ref, w_qkv_ref, w_fc_ref, w_proj_ref, bias_ref,
                  w_hin_ref, b_hin_ref, w_hout_ref, out_bias_ref,
                  out_ref):
    f32 = jnp.float32

    def layer_norm(x, gb):                       # gb: (2, H) = [gamma; beta]
        mu = jnp.mean(x, axis=-1, keepdims=True)
        xc = x - mu
        var = jnp.mean(xc * xc, axis=-1, keepdims=True)
        return xc * lax.rsqrt(var + LN_EPS) * gb[0:1, :] + gb[1:2, :]

    # ---- embedding: token+position one-hot resolved by one MXU matmul ----
    idx = idx_ref[...]                                              # (B*S, 2) int32
    cols = lax.broadcasted_iota(jnp.int32, (B * S, VOCAB + MAXPOS), 1)
    onehot = ((cols == idx[:, 0:1]) | (cols == idx[:, 1:2])).astype(f32)
    h = jnp.dot(onehot, emb_ref[...], preferred_element_type=f32)   # (B*S, H)

    # ---- additive attention-mask bias (causal & key padding), built once ----
    key_ok = mask_ref[...] > 0                                      # (B, S)
    qpos = lax.broadcasted_iota(jnp.int32, (S, S), 0)
    kpos = lax.broadcasted_iota(jnp.int32, (S, S), 1)
    valid = (kpos <= qpos)[None, :, :] & key_ok[:, None, :]         # (B, S, S)
    attn_bias = jnp.where(valid, 0.0, -1e30)                        # (B, S, S) f32

    for l in range(LAYERS):                                         # static unroll
        bias_l = bias_ref[l]                                        # (4, 4H) padded bias slab
        w_proj_l = w_proj_ref[l]                                    # (5H, H): [attn_proj; mlp_proj]

        # ------------- attention sub-block -------------
        a = layer_norm(h, ln_ref[2 * l])
        # 1/sqrt(DH) is pre-folded into the Q columns of w_qkv at init.
        qkv = (jnp.dot(a, w_qkv_ref[l], preferred_element_type=f32)
               + bias_l[0:1, 0:3 * H])                              # (B*S, 3H)

        acc = jnp.zeros((B * S, H), f32)
        for hd in range(NH):                                        # static unroll over heads
            q = qkv[:, hd * DH:(hd + 1) * DH].reshape(B, S, DH)
            k = qkv[:, H + hd * DH:H + (hd + 1) * DH].reshape(B, S, DH)
            v = qkv[:, 2 * H + hd * DH:2 * H + (hd + 1) * DH].reshape(B, S, DH)
            # single-batch-dim einsums (k.T never materialized)
            att = jnp.einsum("bqd,bkd->bqk", q, k,
                             preferred_element_type=f32) + attn_bias
            att = att - jnp.max(att, axis=-1, keepdims=True)
            p = jnp.exp(att)
            p = p / jnp.sum(p, axis=-1, keepdims=True)              # exact softmax denom
            ctx = jnp.einsum("bqk,bkd->bqd", p, v, preferred_element_type=f32)
            # push this head straight through its rows of the output projection
            # (sublane slice of w_proj_l) -> no lane-axis concat of head outputs.
            acc = acc + jnp.dot(ctx.reshape(B * S, DH),
                                w_proj_l[hd * DH:(hd + 1) * DH, :],
                                preferred_element_type=f32)
        h = h + acc + bias_l[1:2, 0:H]                              # proj bias + residual

        # ------------- MLP sub-block -------------
        m = layer_norm(h, ln_ref[2 * l + 1])
        m = jnp.dot(m, w_fc_ref[l], preferred_element_type=f32) + bias_l[2:3, :]
        m = jax.nn.gelu(m, approximate=True)                        # GPT-2 gelu_new
        h = h + jnp.dot(m, w_proj_l[H:5 * H, :],
                        preferred_element_type=f32) + bias_l[3:4, 0:H]

    out = layer_norm(h, ln_ref[2 * LAYERS])                         # (B*S, H)

    # ---- last-token pooling: static sublane slice (row S-1 of each sequence) ----
    pooled = out.reshape(B, S, H)[:, S - 1:S, :].reshape(B, H)      # (B, H)

    # ---- distinguisher head ----
    w_hin = w_hin_ref[...]                                          # (H+LOGITS_DIM, GH)
    b_hin = b_hin_ref[...]                                          # (2, GH)
    w_hout = w_hout_ref[...]                                        # (GH+HALF_LOGITS, NUM_OUT)

    red = jnp.dot(pooled, w_hin[0:H, :], preferred_element_type=f32) + b_hin[0:1, :]
    hid = (jnp.dot(logits_ref[...], w_hin[H:H + LOGITS_DIM, :],
                   preferred_element_type=f32) + b_hin[1:2, :])
    hid = jnp.maximum(hid, 0.0)                                     # relu
    # cat([red, hid],1) @ cat([gpt_head, logits_head],1).T  ==  split-sum form
    scores = (jnp.dot(red, w_hout[0:GH, :], preferred_element_type=f32)
              + jnp.dot(hid, w_hout[GH:GH + HALF_LOGITS, :], preferred_element_type=f32)
              + out_bias_ref[...])                                  # (B, NUM_OUT)
    probs = jax.nn.sigmoid(scores)

    # BCELoss with PyTorch's log clamp at -100 (no NaN/-inf on saturation)
    y = y_ref[...]                                                  # (B, NUM_OUT)
    log_p = jnp.maximum(jnp.log(probs), -100.0)
    log_q = jnp.maximum(jnp.log(1.0 - probs), -100.0)
    loss = jnp.mean(-(y * log_p + (1.0 - y) * log_q),
                    axis=(0, 1), keepdims=True)                     # (1, 1)

    # ---- one lane-dense (8,128) output slab: lane0=scores, lane1=probs, lane2=loss ----
    packed = jnp.concatenate(
        [scores, probs, jnp.broadcast_to(loss, (B, 1)),
         jnp.zeros((B, OUT_LANES - 3), f32)], axis=1)               # (B, 128)
    out_ref[...] = jnp.concatenate(
        [packed, jnp.zeros((OUT_ROWS - B, OUT_LANES), f32)], axis=0)


# ----------------------------- wrapper -----------------------------
def forward(params, input_ids, attention_mask, logits_in, labels):
    b, s = input_ids.shape
    pos = jnp.broadcast_to(jnp.arange(s, dtype=jnp.int32), (b, s))
    # fused (token, VOCAB+position) index pair per row -> in-kernel one-hot embed
    idx = jnp.stack([input_ids.astype(jnp.int32).reshape(-1),
                     (pos + VOCAB).reshape(-1)], axis=1)            # (B*S, 2)

    args = (idx, attention_mask.astype(jnp.int32), logits_in,
            labels.reshape(b, NUM_OUT).astype(jnp.float32),
            params["emb"], params["ln"], params["w_qkv"], params["w_fc"],
            params["w_proj"], params["bias"], params["w_head_in"],
            params["b_head_in"], params["w_head_out"], params["out_bias"])

    vmem = pl.BlockSpec(memory_space=pltpu.MemorySpace.VMEM)
    slab = pl.pallas_call(
        _fused_kernel,
        out_shape=jax.ShapeDtypeStruct((OUT_ROWS, OUT_LANES), jnp.float32),
        in_specs=[vmem] * len(args),
        out_specs=vmem,
    )(*args)

    scores = slab[:b, 0:1]
    probs = slab[:b, 1:2]
    loss = slab[0, 2]
    return scores, probs, loss


# ----------------------------- params -----------------------------
def init_params(key):
    keys = iter(jax.random.split(key, 32))

    def normal(shape, scale=0.02):
        return scale * jax.random.normal(next(keys), shape, jnp.float32)

    attn_scale = 1.0 / math.sqrt(DH)

    # embedding slab: rows [0:VOCAB) = wte, rows [VOCAB:VOCAB+MAXPOS) = wpe
    emb = jnp.concatenate([normal((VOCAB, H)), normal((MAXPOS, H))], axis=0)

    # LayerNorm slab (2*LAYERS+1, 2, H): [2l]=ln1, [2l+1]=ln2, [-1]=ln_f; row0=g,row1=b
    ln = jnp.stack([jnp.ones((2 * LAYERS + 1, H), jnp.float32),
                    jnp.zeros((2 * LAYERS + 1, H), jnp.float32)], axis=1)

    # all weights pre-transposed to (K, N) and stacked over layers
    w_qkv = normal((LAYERS, H, 3 * H))
    w_qkv = w_qkv.at[:, :, :H].multiply(attn_scale)   # fold 1/sqrt(DH) into Q columns
    b_qkv = jnp.zeros((LAYERS, 3 * H), jnp.float32)   # (Q bias would be scaled too; zero here)
    w_ap = normal((LAYERS, H, H));     b_ap = jnp.zeros((LAYERS, H), jnp.float32)
    w_fc = normal((LAYERS, H, 4 * H)); b_fc = jnp.zeros((LAYERS, 4 * H), jnp.float32)
    w_mp = normal((LAYERS, 4 * H, H)); b_mp = jnp.zeros((LAYERS, H), jnp.float32)

    # attn-proj and mlp-proj share lane width H -> stack along K: (LAYERS, 5H, H)
    w_proj = jnp.concatenate([w_ap, w_mp], axis=1)

    def pad_to(x, n):
        return jnp.concatenate(
            [x, jnp.zeros(x.shape[:-1] + (n - x.shape[-1],), jnp.float32)], axis=-1)

    # one padded bias slab per layer: rows = [qkv | attn_proj | fc | mlp_proj], width 4H
    bias = jnp.stack([pad_to(b_qkv, 4 * H), pad_to(b_ap, 4 * H),
                      b_fc, pad_to(b_mp, 4 * H)], axis=1)           # (LAYERS, 4, 4H)

    # ---- distinguisher head (pre-transposed (K, N), packed) ----
    assert GH == HALF_LOGITS
    w_head_in = jnp.concatenate([normal((H, GH), 0.1),              # gpt_dim_reduction
                                 normal((LOGITS_DIM, HALF_LOGITS), 0.1)],  # logits_hidden
                                axis=0)                             # (H+LOGITS_DIM, GH)
    b_head_in = jnp.zeros((2, GH), jnp.float32)                     # row0=dim_red, row1=hidden
    w_head_out = jnp.concatenate(
        [jnp.zeros((GH, NUM_OUT), jnp.float32),                     # gpt_linear_head (torch.zeros)
         jax.random.normal(next(keys), (HALF_LOGITS, NUM_OUT), jnp.float32)],  # torch.randn
        axis=0)                                                     # (GH+HALF_LOGITS, NUM_OUT)
    bound = 1.0 / math.sqrt(GH + HALF_LOGITS)
    out_bias = jax.random.uniform(next(keys), (1, NUM_OUT), jnp.float32, -bound, bound)

    return dict(emb=emb, ln=ln, w_qkv=w_qkv, w_fc=w_fc, w_proj=w_proj, bias=bias,
                w_head_in=w_head_in, b_head_in=b_head_in,
                w_head_out=w_head_out, out_bias=out_bias)


# ----------------------------- main -----------------------------
if __name__ == "__main__":
    key = jax.random.PRNGKey(0)
    kp, kid, klg, klb = jax.random.split(key, 4)
    params = init_params(kp)

    input_ids = jax.random.randint(kid, (B, S), 0, VOCAB, dtype=jnp.int32)
    attention_mask = jnp.ones((B, S), jnp.int32)
    logits_in = jax.random.normal(klg, (B, LOGITS_DIM), jnp.float32)
    labels = jax.random.bernoulli(klb, 0.5, (B,)).astype(jnp.float32)

    fwd = jax.jit(forward)
    scores, probs, loss = fwd(params, input_ids, attention_mask, logits_in, labels)
    jax.block_until_ready((scores, probs, loss))

    assert scores.shape == (B, NUM_OUT) and probs.shape == (B, NUM_OUT)
    assert bool(jnp.all(jnp.isfinite(scores))) and bool(jnp.isfinite(loss))
    print("KERNEL_OK")
</pallas_src>

<mosaic_0001>
module attributes {stable_mosaic.version = 11 : i64} {
  func.func @_fused_kernel(%arg0: memref<16x2xi32, #tpu.memory_space<vmem>>, %arg1: memref<2x8xi32, #tpu.memory_space<vmem>>, %arg2: memref<2x16xf32, #tpu.memory_space<vmem>>, %arg3: memref<2x1xf32, #tpu.memory_space<vmem>>, %arg4: memref<80x32xf32, #tpu.memory_space<vmem>>, %arg5: memref<5x2x32xf32, #tpu.memory_space<vmem>>, %arg6: memref<2x32x96xf32, #tpu.memory_space<vmem>>, %arg7: memref<2x32x128xf32, #tpu.memory_space<vmem>>, %arg8: memref<2x160x32xf32, #tpu.memory_space<vmem>>, %arg9: memref<2x4x128xf32, #tpu.memory_space<vmem>>, %arg10: memref<48x8xf32, #tpu.memory_space<vmem>>, %arg11: memref<2x8xf32, #tpu.memory_space<vmem>>, %arg12: memref<16x1xf32, #tpu.memory_space<vmem>>, %arg13: memref<1x1xf32, #tpu.memory_space<vmem>>, %arg14: memref<8x128xf32, #tpu.memory_space<vmem>>) attributes {dimension_semantics = [], scalar_prefetch = 0 : i64, scratch_operands = 0 : i64, tpu.core_type = #tpu.core_type<tc>} {
    %c0 = arith.constant 0 : index
    %c0_0 = arith.constant 0 : index
    %0 = vector.load %arg0[%c0, %c0_0] : memref<16x2xi32, #tpu.memory_space<vmem>>, vector<16x2xi32>
    %1 = tpu.iota {dimensions = array<i32: 1>} : vector<16x80xi32>
    %2 = vector.extract_strided_slice %0 {offsets = [0, 0], sizes = [16, 1], strides = [1, 1]} : vector<16x2xi32> to vector<16x1xi32>
    %3 = vector.broadcast %2 : vector<16x1xi32> to vector<16x80xi32>
    %4 = arith.cmpi eq, %1, %3 : vector<16x80xi32>
    %5 = vector.extract_strided_slice %0 {offsets = [0, 1], sizes = [16, 1], strides = [1, 1]} : vector<16x2xi32> to vector<16x1xi32>
    %6 = vector.broadcast %5 : vector<16x1xi32> to vector<16x80xi32>
    %7 = arith.cmpi eq, %1, %6 : vector<16x80xi32>
    %8 = arith.ori %4, %7 : vector<16x80xi1>
    %9 = arith.extui %8 : vector<16x80xi1> to vector<16x80xi32>
    %10 = arith.sitofp %9 : vector<16x80xi32> to vector<16x80xf32>
    %c0_1 = arith.constant 0 : index
    %c0_2 = arith.constant 0 : index
    %11 = vector.load %arg4[%c0_1, %c0_2] : memref<80x32xf32, #tpu.memory_space<vmem>>, vector<80x32xf32>
    %cst = arith.constant dense<0.000000e+00> : vector<16x32xf32>
    %12 = tpu.matmul %10, %11, %cst {dimension_numbers = #tpu.dot_dimension_numbers<[1], [0], [0], [1], [0, 0, 1, 1], [], []>} : vector<16x80xf32>, vector<80x32xf32>, vector<16x32xf32> -> vector<16x32xf32>
    %c0_3 = arith.constant 0 : index
    %c0_4 = arith.constant 0 : index
    %13 = vector.load %arg1[%c0_3, %c0_4] : memref<2x8xi32, #tpu.memory_space<vmem>>, vector<2x8xi32>
    %c0_i32 = arith.constant 0 : i32
    %14 = vector.broadcast %c0_i32 : i32 to vector<2x8xi32>
    %15 = arith.cmpi sgt, %13, %14 : vector<2x8xi32>
    %16 = tpu.iota {dimensions = array<i32: 0>} : vector<8x8xi32>
    %17 = tpu.iota {dimensions = array<i32: 1>} : vector<8x8xi32>
    %18 = arith.cmpi sle, %17, %16 : vector<8x8xi32>
    %19 = vector.shape_cast %18 : vector<8x8xi1> to vector<1x8x8xi1>
    %20 = vector.shape_cast %15 : vector<2x8xi1> to vector<2x1x8xi1>
    %21 = vector.broadcast %19 : vector<1x8x8xi1> to vector<2x8x8xi1>
    %22 = vector.broadcast %20 : vector<2x1x8xi1> to vector<2x8x8xi1>
    %23 = arith.andi %21, %22 : vector<2x8x8xi1>
    %cst_5 = arith.constant 0.000000e+00 : f32
    %cst_6 = arith.constant -1.000000e+30 : f32
    %24 = vector.broadcast %cst_5 : f32 to vector<2x8x8xf32>
    %25 = vector.broadcast %cst_6 : f32 to vector<2x8x8xf32>
    %26 = arith.select %23, %24, %25 : vector<2x8x8xi1>, vector<2x8x8xf32>
    %c0_7 = arith.constant 0 : index
    %c0_8 = arith.constant 0 : index
    %c0_9 = arith.constant 0 : index
    %27 = vector.load %arg9[%c0_7, %c0_8, %c0_9] : memref<2x4x128xf32, #tpu.memory_space<vmem>>, vector<1x4x128xf32>
    %28 = vector.shape_cast %27 : vector<1x4x128xf32> to vector<4x128xf32>
    %c0_10 = arith.constant 0 : index
    %c0_11 = arith.constant 0 : index
    %c0_12 = arith.constant 0 : index
    %29 = vector.load %arg8[%c0_10, %c0_11, %c0_12] : memref<2x160x32xf32, #tpu.memory_space<vmem>>, vector<1x160x32xf32>
    %30 = vector.shape_cast %29 : vector<1x160x32xf32> to vector<160x32xf32>
    %c0_13 = arith.constant 0 : index
    %c0_14 = arith.constant 0 : index
    %c0_15 = arith.constant 0 : index
    %31 = vector.load %arg5[%c0_13, %c0_14, %c0_15] : memref<5x2x32xf32, #tpu.memory_space<vmem>>, vector<1x2x32xf32>
    %32 = vector.shape_cast %31 : vector<1x2x32xf32> to vector<2x32xf32>
    %cst_16 = arith.constant dense<0.000000e+00> : vector<16xf32>
    %33 = vector.multi_reduction <add>, %12, %cst_16 [1] : vector<16x32xf32> to vector<16xf32>
    %34 = vector.shape_cast %33 : vector<16xf32> to vector<16x1xf32>
    %cst_17 = arith.constant 3.200000e+01 : f32
    %35 = vector.broadcast %cst_17 : f32 to vector<16x1xf32>
    %36 = arith.divf %34, %35 : vector<16x1xf32>
    %37 = vector.broadcast %36 : vector<16x1xf32> to vector<16x32xf32>
    %38 = arith.subf %12, %37 : vector<16x32xf32>
    %39 = arith.mulf %38, %38 : vector<16x32xf32>
    %cst_18 = arith.constant dense<0.000000e+00> : vector<16xf32>
    %40 = vector.multi_reduction <add>, %39, %cst_18 [1] : vector<16x32xf32> to vector<16xf32>
    %41 = vector.shape_cast %40 : vector<16xf32> to vector<16x1xf32>
    %cst_19 = arith.constant 3.200000e+01 : f32
    %42 = vector.broadcast %cst_19 : f32 to vector<16x1xf32>
    %43 = arith.divf %41, %42 : vector<16x1xf32>
    %cst_20 = arith.constant 9.99999974E-6 : f32
    %44 = vector.broadcast %cst_20 : f32 to vector<16x1xf32>
    %45 = arith.addf %43, %44 : vector<16x1xf32>
    %46 = math.rsqrt %45 : vector<16x1xf32>
    %47 = vector.broadcast %46 : vector<16x1xf32> to vector<16x32xf32>
    %48 = arith.mulf %38, %47 : vector<16x32xf32>
    %49 = vector.extract_strided_slice %32 {offsets = [0, 0], sizes = [1, 32], strides = [1, 1]} : vector<2x32xf32> to vector<1x32xf32>
    %50 = vector.broadcast %49 : vector<1x32xf32> to vector<16x32xf32>
    %51 = arith.mulf %48, %50 : vector<16x32xf32>
    %52 = vector.extract_strided_slice %32 {offsets = [1, 0], sizes = [1, 32], strides = [1, 1]} : vector<2x32xf32> to vector<1x32xf32>
    %53 = vector.broadcast %52 : vector<1x32xf32> to vector<16x32xf32>
    %54 = arith.addf %51, %53 : vector<16x32xf32>
    %c0_21 = arith.constant 0 : index
    %c0_22 = arith.constant 0 : index
    %c0_23 = arith.constant 0 : index
    %55 = vector.load %arg6[%c0_21, %c0_22, %c0_23] : memref<2x32x96xf32, #tpu.memory_space<vmem>>, vector<1x32x96xf32>
    %56 = vector.shape_cast %55 : vector<1x32x96xf32> to vector<32x96xf32>
    %cst_24 = arith.constant dense<0.000000e+00> : vector<16x96xf32>
    %57 = tpu.matmul %54, %56, %cst_24 {dimension_numbers = #tpu.dot_dimension_numbers<[1], [0], [0], [1], [0, 0, 1, 1], [], []>} : vector<16x32xf32>, vector<32x96xf32>, vector<16x96xf32> -> vector<16x96xf32>
    %58 = vector.extract_strided_slice %28 {offsets = [0, 0], sizes = [1, 96], strides = [1, 1]} : vector<4x128xf32> to vector<1x96xf32>
    %59 = vector.broadcast %58 : vector<1x96xf32> to vector<16x96xf32>
    %60 = arith.addf %57, %59 : vector<16x96xf32>
    %cst_25 = arith.constant 0.000000e+00 : f32
    %61 = vector.broadcast %cst_25 : f32 to vector<16x32xf32>
    %62 = vector.extract_strided_slice %60 {offsets = [0, 0], sizes = [16, 8], strides = [1, 1]} : vector<16x96xf32> to vector<16x8xf32>
    %63 = vector.shape_cast %62 : vector<16x8xf32> to vector<2x8x8xf32>
    %64 = vector.extract_strided_slice %60 {offsets = [0, 32], sizes = [16, 8], strides = [1, 1]} : vector<16x96xf32> to vector<16x8xf32>
    %65 = vector.shape_cast %64 : vector<16x8xf32> to vector<2x8x8xf32>
    %66 = vector.extract_strided_slice %60 {offsets = [0, 64], sizes = [16, 8], strides = [1, 1]} : vector<16x96xf32> to vector<16x8xf32>
    %67 = vector.shape_cast %66 : vector<16x8xf32> to vector<2x8x8xf32>
    "tpu.trace_start"() <{level = 10 : i32, message = "bqd,bkd->bqk"}> : () -> ()
    %cst_26 = arith.constant dense<0.000000e+00> : vector<2x8x8xf32>
    %68 = tpu.matmul %63, %65, %cst_26 {dimension_numbers = #tpu.dot_dimension_numbers<[2], [2], [1], [1], [0, 0, 0, 1, 1, 1], [0], [0]>} : vector<2x8x8xf32>, vector<2x8x8xf32>, vector<2x8x8xf32> -> vector<2x8x8xf32>
    "tpu.trace_stop"() : () -> ()
    %69 = arith.addf %68, %26 : vector<2x8x8xf32>
    %cst_27 = arith.constant dense<0xFF800000> : vector<2x8xf32>
    %70 = vector.multi_reduction <maximumf>, %69, %cst_27 [2] : vector<2x8x8xf32> to vector<2x8xf32>
    %71 = vector.shape_cast %70 : vector<2x8xf32> to vector<2x8x1xf32>
    %72 = vector.broadcast %71 : vector<2x8x1xf32> to vector<2x8x8xf32>
    %73 = arith.subf %69, %72 : vector<2x8x8xf32>
    %74 = math.exp %73 : vector<2x8x8xf32>
    %cst_28 = arith.constant dense<0.000000e+00> : vector<2x8xf32>
    %75 = vector.multi_reduction <add>, %74, %cst_28 [2] : vector<2x8x8xf32> to vector<2x8xf32>
    %76 = vector.shape_cast %75 : vector<2x8xf32> to vector<2x8x1xf32>
    %77 = vector.broadcast %76 : vector<2x8x1xf32> to vector<2x8x8xf32>
    %78 = arith.divf %74, %77 : vector<2x8x8xf32>
    "tpu.trace_start"() <{level = 10 : i32, message = "bqk,bkd->bqd"}> : () -> ()
    %cst_29 = arith.constant dense<0.000000e+00> : vector<2x8x8xf32>
    %79 = tpu.matmul %78, %67, %cst_29 {dimension_numbers = #tpu.dot_dimension_numbers<[2], [1], [1], [2], [0, 0, 0, 1, 1, 2], [0], [0]>} : vector<2x8x8xf32>, vector<2x8x8xf32>, vector<2x8x8xf32> -> vector<2x8x8xf32>
    "tpu.trace_stop"() : () -> ()
    %80 = vector.shape_cast %79 : vector<2x8x8xf32> to vector<16x8xf32>
    %81 = vector.extract_strided_slice %30 {offsets = [0, 0], sizes = [8, 32], strides = [1, 1]} : vector<160x32xf32> to vector<8x32xf32>
    %cst_30 = arith.constant dense<0.000000e+00> : vector<16x32xf32>
    %82 = tpu.matmul %80, %81, %cst_30 {dimension_numbers = #tpu.dot_dimension_numbers<[1], [0], [0], [1], [0, 0, 1, 1], [], []>} : vector<16x8xf32>, vector<8x32xf32>, vector<16x32xf32> -> vector<16x32xf32>
    %83 = arith.addf %61, %82 : vector<16x32xf32>
    %84 = vector.extract_strided_slice %60 {offsets = [0, 8], sizes = [16, 8], strides = [1, 1]} : vector<16x96xf32> to vector<16x8xf32>
    %85 = vector.shape_cast %84 : vector<16x8xf32> to vector<2x8x8xf32>
    %86 = vector.extract_strided_slice %60 {offsets = [0, 40], sizes = [16, 8], strides = [1, 1]} : vector<16x96xf32> to vector<16x8xf32>
    %87 = vector.shape_cast %86 : vector<16x8xf32> to vector<2x8x8xf32>
    %88 = vector.extract_strided_slice %60 {offsets = [0, 72], sizes = [16, 8], strides = [1, 1]} : vector<16x96xf32> to vector<16x8xf32>
    %89 = vector.shape_cast %88 : vector<16x8xf32> to vector<2x8x8xf32>
    "tpu.trace_start"() <{level = 10 : i32, message = "bqd,bkd->bqk"}> : () -> ()
    %cst_31 = arith.constant dense<0.000000e+00> : vector<2x8x8xf32>
    %90 = tpu.matmul %85, %87, %cst_31 {dimension_numbers = #tpu.dot_dimension_numbers<[2], [2], [1], [1], [0, 0, 0, 1, 1, 1], [0], [0]>} : vector<2x8x8xf32>, vector<2x8x8xf32>, vector<2x8x8xf32> -> vector<2x8x8xf32>
    "tpu.trace_stop"() : () -> ()
    %91 = arith.addf %90, %26 : vector<2x8x8xf32>
    %cst_32 = arith.constant dense<0xFF800000> : vector<2x8xf32>
    %92 = vector.multi_reduction <maximumf>, %91, %cst_32 [2] : vector<2x8x8xf32> to vector<2x8xf32>
    %93 = vector.shape_cast %92 : vector<2x8xf32> to vector<2x8x1xf32>
    %94 = vector.broadcast %93 : vector<2x8x1xf32> to vector<2x8x8xf32>
    %95 = arith.subf %91, %94 : vector<2x8x8xf32>
    %96 = math.exp %95 : vector<2x8x8xf32>
    %cst_33 = arith.constant dense<0.000000e+00> : vector<2x8xf32>
    %97 = vector.multi_reduction <add>, %96, %cst_33 [2] : vector<2x8x8xf32> to vector<2x8xf32>
    %98 = vector.shape_cast %97 : vector<2x8xf32> to vector<2x8x1xf32>
    %99 = vector.broadcast %98 : vector<2x8x1xf32> to vector<2x8x8xf32>
    %100 = arith.divf %96, %99 : vector<2x8x8xf32>
    "tpu.trace_start"() <{level = 10 : i32, message = "bqk,bkd->bqd"}> : () -> ()
    %cst_34 = arith.constant dense<0.000000e+00> : vector<2x8x8xf32>
    %101 = tpu.matmul %100, %89, %cst_34 {dimension_numbers = #tpu.dot_dimension_numbers<[2], [1], [1], [2], [0, 0, 0, 1, 1, 2], [0], [0]>} : vector<2x8x8xf32>, vector<2x8x8xf32>, vector<2x8x8xf32> -> vector<2x8x8xf32>
    "tpu.trace_stop"() : () -> ()
    %102 = vector.shape_cast %101 : vector<2x8x8xf32> to vector<16x8xf32>
    %103 = vector.extract_strided_slice %30 {offsets = [8, 0], sizes = [8, 32], strides = [1, 1]} : vector<160x32xf32> to vector<8x32xf32>
    %cst_35 = arith.constant dense<0.000000e+00> : vector<16x32xf32>
    %104 = tpu.matmul %102, %103, %cst_35 {dimension_numbers = #tpu.dot_dimension_numbers<[1], [0], [0], [1], [0, 0, 1, 1], [], []>} : vector<16x8xf32>, vector<8x32xf32>, vector<16x32xf32> -> vector<16x32xf32>
    %105 = arith.addf %83, %104 : vector<16x32xf32>
    %106 = vector.extract_strided_slice %60 {offsets = [0, 16], sizes = [16, 8], strides = [1, 1]} : vector<16x96xf32> to vector<16x8xf32>
    %107 = vector.shape_cast %106 : vector<16x8xf32> to vector<2x8x8xf32>
    %108 = vector.extract_strided_slice %60 {offsets = [0, 48], sizes = [16, 8], strides = [1, 1]} : vector<16x96xf32> to vector<16x8xf32>
    %109 = vector.shape_cast %108 : vector<16x8xf32> to vector<2x8x8xf32>
    %110 = vector.extract_strided_slice %60 {offsets = [0, 80], sizes = [16, 8], strides = [1, 1]} : vector<16x96xf32> to vector<16x8xf32>
    %111 = vector.shape_cast %110 : vector<16x8xf32> to vector<2x8x8xf32>
    "tpu.trace_start"() <{level = 10 : i32, message = "bqd,bkd->bqk"}> : () -> ()
    %cst_36 = arith.constant dense<0.000000e+00> : vector<2x8x8xf32>
    %112 = tpu.matmul %107, %109, %cst_36 {dimension_numbers = #tpu.dot_dimension_numbers<[2], [2], [1], [1], [0, 0, 0, 1, 1, 1], [0], [0]>} : vector<2x8x8xf32>, vector<2x8x8xf32>, vector<2x8x8xf32> -> vector<2x8x8xf32>
    "tpu.trace_stop"() : () -> ()
    %113 = arith.addf %112, %26 : vector<2x8x8xf32>
    %cst_37 = arith.constant dense<0xFF800000> : vector<2x8xf32>
    %114 = vector.multi_reduction <maximumf>, %113, %cst_37 [2] : vector<2x8x8xf32> to vector<2x8xf32>
    %115 = vector.shape_cast %114 : vector<2x8xf32> to vector<2x8x1xf32>
    %116 = vector.broadcast %115 : vector<2x8x1xf32> to vector<2x8x8xf32>
    %117 = arith.subf %113, %116 : vector<2x8x8xf32>
    %118 = math.exp %117 : vector<2x8x8xf32>
    %cst_38 = arith.constant dense<0.000000e+00> : vector<2x8xf32>
    %119 = vector.multi_reduction <add>, %118, %cst_38 [2] : vector<2x8x8xf32> to vector<2x8xf32>
    %120 = vector.shape_cast %119 : vector<2x8xf32> to vector<2x8x1xf32>
    %121 = vector.broadcast %120 : vector<2x8x1xf32> to vector<2x8x8xf32>
    %122 = arith.divf %118, %121 : vector<2x8x8xf32>
    "tpu.trace_start"() <{level = 10 : i32, message = "bqk,bkd->bqd"}> : () -> ()
    %cst_39 = arith.constant dense<0.000000e+00> : vector<2x8x8xf32>
    %123 = tpu.matmul %122, %111, %cst_39 {dimension_numbers = #tpu.dot_dimension_numbers<[2], [1], [1], [2], [0, 0, 0, 1, 1, 2], [0], [0]>} : vector<2x8x8xf32>, vector<2x8x8xf32>, vector<2x8x8xf32> -> vector<2x8x8xf32>
    "tpu.trace_stop"() : () -> ()
    %124 = vector.shape_cast %123 : vector<2x8x8xf32> to vector<16x8xf32>
    %125 = vector.extract_strided_slice %30 {offsets = [16, 0], sizes = [8, 32], strides = [1, 1]} : vector<160x32xf32> to vector<8x32xf32>
    %cst_40 = arith.constant dense<0.000000e+00> : vector<16x32xf32>
    %126 = tpu.matmul %124, %125, %cst_40 {dimension_numbers = #tpu.dot_dimension_numbers<[1], [0], [0], [1], [0, 0, 1, 1], [], []>} : vector<16x8xf32>, vector<8x32xf32>, vector<16x32xf32> -> vector<16x32xf32>
    %127 = arith.addf %105, %126 : vector<16x32xf32>
    %128 = vector.extract_strided_slice %60 {offsets = [0, 24], sizes = [16, 8], strides = [1, 1]} : vector<16x96xf32> to vector<16x8xf32>
    %129 = vector.shape_cast %128 : vector<16x8xf32> to vector<2x8x8xf32>
    %130 = vector.extract_strided_slice %60 {offsets = [0, 56], sizes = [16, 8], strides = [1, 1]} : vector<16x96xf32> to vector<16x8xf32>
    %131 = vector.shape_cast %130 : vector<16x8xf32> to vector<2x8x8xf32>
    %132 = vector.extract_strided_slice %60 {offsets = [0, 88], sizes = [16, 8], strides = [1, 1]} : vector<16x96xf32> to vector<16x8xf32>
    %133 = vector.shape_cast %132 : vector<16x8xf32> to vector<2x8x8xf32>
    "tpu.trace_start"() <{level = 10 : i32, message = "bqd,bkd->bqk"}> : () -> ()
    %cst_41 = arith.constant dense<0.000000e+00> : vector<2x8x8xf32>
    %134 = tpu.matmul %129, %131, %cst_41 {dimension_numbers = #tpu.dot_dimension_numbers<[2], [2], [1], [1], [0, 0, 0, 1, 1, 1], [0], [0]>} : vector<2x8x8xf32>, vector<2x8x8xf32>, vector<2x8x8xf32> -> vector<2x8x8xf32>
    "tpu.trace_stop"() : () -> ()
    %135 = arith.addf %134, %26 : vector<2x8x8xf32>
    %cst_42 = arith.constant dense<0xFF800000> : vector<2x8xf32>
    %136 = vector.multi_reduction <maximumf>, %135, %cst_42 [2] : vector<2x8x8xf32> to vector<2x8xf32>
    %137 = vector.shape_cast %136 : vector<2x8xf32> to vector<2x8x1xf32>
    %138 = vector.broadcast %137 : vector<2x8x1xf32> to vector<2x8x8xf32>
    %139 = arith.subf %135, %138 : vector<2x8x8xf32>
    %140 = math.exp %139 : vector<2x8x8xf32>
    %cst_43 = arith.constant dense<0.000000e+00> : vector<2x8xf32>
    %141 = vector.multi_reduction <add>, %140, %cst_43 [2] : vector<2x8x8xf32> to vector<2x8xf32>
    %142 = vector.shape_cast %141 : vector<2x8xf32> to vector<2x8x1xf32>
    %143 = vector.broadcast %142 : vector<2x8x1xf32> to vector<2x8x8xf32>
    %144 = arith.divf %140, %143 : vector<2x8x8xf32>
    "tpu.trace_start"() <{level = 10 : i32, message = "bqk,bkd->bqd"}> : () -> ()
    %cst_44 = arith.constant dense<0.000000e+00> : vector<2x8x8xf32>
    %145 = tpu.matmul %144, %133, %cst_44 {dimension_numbers = #tpu.dot_dimension_numbers<[2], [1], [1], [2], [0, 0, 0, 1, 1, 2], [0], [0]>} : vector<2x8x8xf32>, vector<2x8x8xf32>, vector<2x8x8xf32> -> vector<2x8x8xf32>
    "tpu.trace_stop"() : () -> ()
    %146 = vector.shape_cast %145 : vector<2x8x8xf32> to vector<16x8xf32>
    %147 = vector.extract_strided_slice %30 {offsets = [24, 0], sizes = [8, 32], strides = [1, 1]} : vector<160x32xf32> to vector<8x32xf32>
    %cst_45 = arith.constant dense<0.000000e+00> : vector<16x32xf32>
    %148 = tpu.matmul %146, %147, %cst_45 {dimension_numbers = #tpu.dot_dimension_numbers<[1], [0], [0], [1], [0, 0, 1, 1], [], []>} : vector<16x8xf32>, vector<8x32xf32>, vector<16x32xf32> -> vector<16x32xf32>
    %149 = arith.addf %127, %148 : vector<16x32xf32>
    %150 = arith.addf %12, %149 : vector<16x32xf32>
    %151 = vector.extract_strided_slice %28 {offsets = [1, 0], sizes = [1, 32], strides = [1, 1]} : vector<4x128xf32> to vector<1x32xf32>
    %152 = vector.broadcast %151 : vector<1x32xf32> to vector<16x32xf32>
    %153 = arith.addf %150, %152 : vector<16x32xf32>
    %c1 = arith.constant 1 : index
    %c0_46 = arith.constant 0 : index
    %c0_47 = arith.constant 0 : index
    %154 = vector.load %arg5[%c1, %c0_46, %c0_47] : memref<5x2x32xf32, #tpu.memory_space<vmem>>, vector<1x2x32xf32>
    %155 = vector.shape_cast %154 : vector<1x2x32xf32> to vector<2x32xf32>
    %cst_48 = arith.constant dense<0.000000e+00> : vector<16xf32>
    %156 = vector.multi_reduction <add>, %153, %cst_48 [1] : vector<16x32xf32> to vector<16xf32>
    %157 = vector.shape_cast %156 : vector<16xf32> to vector<16x1xf32>
    %cst_49 = arith.constant 3.200000e+01 : f32
    %158 = vector.broadcast %cst_49 : f32 to vector<16x1xf32>
    %159 = arith.divf %157, %158 : vector<16x1xf32>
    %160 = vector.broadcast %159 : vector<16x1xf32> to vector<16x32xf32>
    %161 = arith.subf %153, %160 : vector<16x32xf32>
    %162 = arith.mulf %161, %161 : vector<16x32xf32>
    %cst_50 = arith.constant dense<0.000000e+00> : vector<16xf32>
    %163 = vector.multi_reduction <add>, %162, %cst_50 [1] : vector<16x32xf32> to vector<16xf32>
    %164 = vector.shape_cast %163 : vector<16xf32> to vector<16x1xf32>
    %cst_51 = arith.constant 3.200000e+01 : f32
    %165 = vector.broadcast %cst_51 : f32 to vector<16x1xf32>
    %166 = arith.divf %164, %165 : vector<16x1xf32>
    %cst_52 = arith.constant 9.99999974E-6 : f32
    %167 = vector.broadcast %cst_52 : f32 to vector<16x1xf32>
    %168 = arith.addf %166, %167 : vector<16x1xf32>
    %169 = math.rsqrt %168 : vector<16x1xf32>
    %170 = vector.broadcast %169 : vector<16x1xf32> to vector<16x32xf32>
    %171 = arith.mulf %161, %170 : vector<16x32xf32>
    %172 = vector.extract_strided_slice %155 {offsets = [0, 0], sizes = [1, 32], strides = [1, 1]} : vector<2x32xf32> to vector<1x32xf32>
    %173 = vector.broadcast %172 : vector<1x32xf32> to vector<16x32xf32>
    %174 = arith.mulf %171, %173 : vector<16x32xf32>
    %175 = vector.extract_strided_slice %155 {offsets = [1, 0], sizes = [1, 32], strides = [1, 1]} : vector<2x32xf32> to vector<1x32xf32>
    %176 = vector.broadcast %175 : vector<1x32xf32> to vector<16x32xf32>
    %177 = arith.addf %174, %176 : vector<16x32xf32>
    %c0_53 = arith.constant 0 : index
    %c0_54 = arith.constant 0 : index
    %c0_55 = arith.constant 0 : index
    %178 = vector.load %arg7[%c0_53, %c0_54, %c0_55] : memref<2x32x128xf32, #tpu.memory_space<vmem>>, vector<1x32x128xf32>
    %179 = vector.shape_cast %178 : vector<1x32x128xf32> to vector<32x128xf32>
    %cst_56 = arith.constant dense<0.000000e+00> : vector<16x128xf32>
    %180 = tpu.matmul %177, %179, %cst_56 {dimension_numbers = #tpu.dot_dimension_numbers<[1], [0], [0], [1], [0, 0, 1, 1], [], []>} : vector<16x32xf32>, vector<32x128xf32>, vector<16x128xf32> -> vector<16x128xf32>
    %181 = vector.extract_strided_slice %28 {offsets = [2, 0], sizes = [1, 128], strides = [1, 1]} : vector<4x128xf32> to vector<1x128xf32>
    %182 = vector.broadcast %181 : vector<1x128xf32> to vector<16x128xf32>
    %183 = arith.addf %180, %182 : vector<16x128xf32>
    %184 = arith.mulf %183, %183 : vector<16x128xf32>
    %185 = arith.mulf %183, %184 : vector<16x128xf32>
    %cst_57 = arith.constant 4.471500e-02 : f32
    %186 = vector.broadcast %cst_57 : f32 to vector<16x128xf32>
    %187 = arith.mulf %186, %185 : vector<16x128xf32>
    %188 = arith.addf %183, %187 : vector<16x128xf32>
    %cst_58 = arith.constant 0.797884583 : f32
    %189 = vector.broadcast %cst_58 : f32 to vector<16x128xf32>
    %190 = arith.mulf %189, %188 : vector<16x128xf32>
    %191 = math.tanh %190 : vector<16x128xf32>
    %cst_59 = arith.constant 1.000000e+00 : f32
    %192 = vector.broadcast %cst_59 : f32 to vector<16x128xf32>
    %193 = arith.addf %192, %191 : vector<16x128xf32>
    %cst_60 = arith.constant 5.000000e-01 : f32
    %194 = vector.broadcast %cst_60 : f32 to vector<16x128xf32>
    %195 = arith.mulf %194, %193 : vector<16x128xf32>
    %196 = arith.mulf %183, %195 : vector<16x128xf32>
    %197 = vector.extract_strided_slice %30 {offsets = [32, 0], sizes = [128, 32], strides = [1, 1]} : vector<160x32xf32> to vector<128x32xf32>
    %cst_61 = arith.constant dense<0.000000e+00> : vector<16x32xf32>
    %198 = tpu.matmul %196, %197, %cst_61 {dimension_numbers = #tpu.dot_dimension_numbers<[1], [0], [0], [1], [0, 0, 1, 1], [], []>} : vector<16x128xf32>, vector<128x32xf32>, vector<16x32xf32> -> vector<16x32xf32>
    %199 = arith.addf %153, %198 : vector<16x32xf32>
    %200 = vector.extract_strided_slice %28 {offsets = [3, 0], sizes = [1, 32], strides = [1, 1]} : vector<4x128xf32> to vector<1x32xf32>
    %201 = vector.broadcast %200 : vector<1x32xf32> to vector<16x32xf32>
    %202 = arith.addf %199, %201 : vector<16x32xf32>
    %c1_62 = arith.constant 1 : index
    %c0_63 = arith.constant 0 : index
    %c0_64 = arith.constant 0 : index
    %203 = vector.load %arg9[%c1_62, %c0_63, %c0_64] : memref<2x4x128xf32, #tpu.memory_space<vmem>>, vector<1x4x128xf32>
    %204 = vector.shape_cast %203 : vector<1x4x128xf32> to vector<4x128xf32>
    %c1_65 = arith.constant 1 : index
    %c0_66 = arith.constant 0 : index
    %c0_67 = arith.constant 0 : index
    %205 = vector.load %arg8[%c1_65, %c0_66, %c0_67] : memref<2x160x32xf32, #tpu.memory_space<vmem>>, vector<1x160x32xf32>
    %206 = vector.shape_cast %205 : vector<1x160x32xf32> to vector<160x32xf32>
    %c2 = arith.constant 2 : index
    %c0_68 = arith.constant 0 : index
    %c0_69 = arith.constant 0 : index
    %207 = vector.load %arg5[%c2, %c0_68, %c0_69] : memref<5x2x32xf32, #tpu.memory_space<vmem>>, vector<1x2x32xf32>
    %208 = vector.shape_cast %207 : vector<1x2x32xf32> to vector<2x32xf32>
    %cst_70 = arith.constant dense<0.000000e+00> : vector<16xf32>
    %209 = vector.multi_reduction <add>, %202, %cst_70 [1] : vector<16x32xf32> to vector<16xf32>
    %210 = vector.shape_cast %209 : vector<16xf32> to vector<16x1xf32>
    %cst_71 = arith.constant 3.200000e+01 : f32
    %211 = vector.broadcast %cst_71 : f32 to vector<16x1xf32>
    %212 = arith.divf %210, %211 : vector<16x1xf32>
    %213 = vector.broadcast %212 : vector<16x1xf32> to vector<16x32xf32>
    %214 = arith.subf %202, %213 : vector<16x32xf32>
    %215 = arith.mulf %214, %214 : vector<16x32xf32>
    %cst_72 = arith.constant dense<0.000000e+00> : vector<16xf32>
    %216 = vector.multi_reduction <add>, %215, %cst_72 [1] : vector<16x32xf32> to vector<16xf32>
    %217 = vector.shape_cast %216 : vector<16xf32> to vector<16x1xf32>
    %cst_73 = arith.constant 3.200000e+01 : f32
    %218 = vector.broadcast %cst_73 : f32 to vector<16x1xf32>
    %219 = arith.divf %217, %218 : vector<16x1xf32>
    %cst_74 = arith.constant 9.99999974E-6 : f32
    %220 = vector.broadcast %cst_74 : f32 to vector<16x1xf32>
    %221 = arith.addf %219, %220 : vector<16x1xf32>
    %222 = math.rsqrt %221 : vector<16x1xf32>
    %223 = vector.broadcast %222 : vector<16x1xf32> to vector<16x32xf32>
    %224 = arith.mulf %214, %223 : vector<16x32xf32>
    %225 = vector.extract_strided_slice %208 {offsets = [0, 0], sizes = [1, 32], strides = [1, 1]} : vector<2x32xf32> to vector<1x32xf32>
    %226 = vector.broadcast %225 : vector<1x32xf32> to vector<16x32xf32>
    %227 = arith.mulf %224, %226 : vector<16x32xf32>
    %228 = vector.extract_strided_slice %208 {offsets = [1, 0], sizes = [1, 32], strides = [1, 1]} : vector<2x32xf32> to vector<1x32xf32>
    %229 = vector.broadcast %228 : vector<1x32xf32> to vector<16x32xf32>
    %230 = arith.addf %227, %229 : vector<16x32xf32>
    %c1_75 = arith.constant 1 : index
    %c0_76 = arith.constant 0 : index
    %c0_77 = arith.constant 0 : index
    %231 = vector.load %arg6[%c1_75, %c0_76, %c0_77] : memref<2x32x96xf32, #tpu.memory_space<vmem>>, vector<1x32x96xf32>
    %232 = vector.shape_cast %231 : vector<1x32x96xf32> to vector<32x96xf32>
    %cst_78 = arith.constant dense<0.000000e+00> : vector<16x96xf32>
    %233 = tpu.matmul %230, %232, %cst_78 {dimension_numbers = #tpu.dot_dimension_numbers<[1], [0], [0], [1], [0, 0, 1, 1], [], []>} : vector<16x32xf32>, vector<32x96xf32>, vector<16x96xf32> -> vector<16x96xf32>
    %234 = vector.extract_strided_slice %204 {offsets = [0, 0], sizes = [1, 96], strides = [1, 1]} : vector<4x128xf32> to vector<1x96xf32>
    %235 = vector.broadcast %234 : vector<1x96xf32> to vector<16x96xf32>
    %236 = arith.addf %233, %235 : vector<16x96xf32>
    %cst_79 = arith.constant 0.000000e+00 : f32
    %237 = vector.broadcast %cst_79 : f32 to vector<16x32xf32>
    %238 = vector.extract_strided_slice %236 {offsets = [0, 0], sizes = [16, 8], strides = [1, 1]} : vector<16x96xf32> to vector<16x8xf32>
    %239 = vector.shape_cast %238 : vector<16x8xf32> to vector<2x8x8xf32>
    %240 = vector.extract_strided_slice %236 {offsets = [0, 32], sizes = [16, 8], strides = [1, 1]} : vector<16x96xf32> to vector<16x8xf32>
    %241 = vector.shape_cast %240 : vector<16x8xf32> to vector<2x8x8xf32>
    %242 = vector.extract_strided_slice %236 {offsets = [0, 64], sizes = [16, 8], strides = [1, 1]} : vector<16x96xf32> to vector<16x8xf32>
    %243 = vector.shape_cast %242 : vector<16x8xf32> to vector<2x8x8xf32>
    "tpu.trace_start"() <{level = 10 : i32, message = "bqd,bkd->bqk"}> : () -> ()
    %cst_80 = arith.constant dense<0.000000e+00> : vector<2x8x8xf32>
    %244 = tpu.matmul %239, %241, %cst_80 {dimension_numbers = #tpu.dot_dimension_numbers<[2], [2], [1], [1], [0, 0, 0, 1, 1, 1], [0], [0]>} : vector<2x8x8xf32>, vector<2x8x8xf32>, vector<2x8x8xf32> -> vector<2x8x8xf32>
    "tpu.trace_stop"() : () -> ()
    %245 = arith.addf %244, %26 : vector<2x8x8xf32>
    %cst_81 = arith.constant dense<0xFF800000> : vector<2x8xf32>
    %246 = vector.multi_reduction <maximumf>, %245, %cst_81 [2] : vector<2x8x8xf32> to vector<2x8xf32>
    %247 = vector.shape_cast %246 : vector<2x8xf32> to vector<2x8x1xf32>
    %248 = vector.broadcast %247 : vector<2x8x1xf32> to vector<2x8x8xf32>
    %249 = arith.subf %245, %248 : vector<2x8x8xf32>
    %250 = math.exp %249 : vector<2x8x8xf32>
    %cst_82 = arith.constant dense<0.000000e+00> : vector<2x8xf32>
    %251 = vector.multi_reduction <add>, %250, %cst_82 [2] : vector<2x8x8xf32> to vector<2x8xf32>
    %252 = vector.shape_cast %251 : vector<2x8xf32> to vector<2x8x1xf32>
    %253 = vector.broadcast %252 : vector<2x8x1xf32> to vector<2x8x8xf32>
    %254 = arith.divf %250, %253 : vector<2x8x8xf32>
    "tpu.trace_start"() <{level = 10 : i32, message = "bqk,bkd->bqd"}> : () -> ()
    %cst_83 = arith.constant dense<0.000000e+00> : vector<2x8x8xf32>
    %255 = tpu.matmul %254, %243, %cst_83 {dimension_numbers = #tpu.dot_dimension_numbers<[2], [1], [1], [2], [0, 0, 0, 1, 1, 2], [0], [0]>} : vector<2x8x8xf32>, vector<2x8x8xf32>, vector<2x8x8xf32> -> vector<2x8x8xf32>
    "tpu.trace_stop"() : () -> ()
    %256 = vector.shape_cast %255 : vector<2x8x8xf32> to vector<16x8xf32>
    %257 = vector.extract_strided_slice %206 {offsets = [0, 0], sizes = [8, 32], strides = [1, 1]} : vector<160x32xf32> to vector<8x32xf32>
    %cst_84 = arith.constant dense<0.000000e+00> : vector<16x32xf32>
    %258 = tpu.matmul %256, %257, %cst_84 {dimension_numbers = #tpu.dot_dimension_numbers<[1], [0], [0], [1], [0, 0, 1, 1], [], []>} : vector<16x8xf32>, vector<8x32xf32>, vector<16x32xf32> -> vector<16x32xf32>
    %259 = arith.addf %237, %258 : vector<16x32xf32>
    %260 = vector.extract_strided_slice %236 {offsets = [0, 8], sizes = [16, 8], strides = [1, 1]} : vector<16x96xf32> to vector<16x8xf32>
    %261 = vector.shape_cast %260 : vector<16x8xf32> to vector<2x8x8xf32>
    %262 = vector.extract_strided_slice %236 {offsets = [0, 40], sizes = [16, 8], strides = [1, 1]} : vector<16x96xf32> to vector<16x8xf32>
    %263 = vector.shape_cast %262 : vector<16x8xf32> to vector<2x8x8xf32>
    %264 = vector.extract_strided_slice %236 {offsets = [0, 72], sizes = [16, 8], strides = [1, 1]} : vector<16x96xf32> to vector<16x8xf32>
    %265 = vector.shape_cast %264 : vector<16x8xf32> to vector<2x8x8xf32>
    "tpu.trace_start"() <{level = 10 : i32, message = "bqd,bkd->bqk"}> : () -> ()
    %cst_85 = arith.constant dense<0.000000e+00> : vector<2x8x8xf32>
    %266 = tpu.matmul %261, %263, %cst_85 {dimension_numbers = #tpu.dot_dimension_numbers<[2], [2], [1], [1], [0, 0, 0, 1, 1, 1], [0], [0]>} : vector<2x8x8xf32>, vector<2x8x8xf32>, vector<2x8x8xf32> -> vector<2x8x8xf32>
    "tpu.trace_stop"() : () -> ()
    %267 = arith.addf %266, %26 : vector<2x8x8xf32>
    %cst_86 = arith.constant dense<0xFF800000> : vector<2x8xf32>
    %268 = vector.multi_reduction <maximumf>, %267, %cst_86 [2] : vector<2x8x8xf32> to vector<2x8xf32>
    %269 = vector.shape_cast %268 : vector<2x8xf32> to vector<2x8x1xf32>
    %270 = vector.broadcast %269 : vector<2x8x1xf32> to vector<2x8x8xf32>
    %271 = arith.subf %267, %270 : vector<2x8x8xf32>
    %272 = math.exp %271 : vector<2x8x8xf32>
    %cst_87 = arith.constant dense<0.000000e+00> : vector<2x8xf32>
    %273 = vector.multi_reduction <add>, %272, %cst_87 [2] : vector<2x8x8xf32> to vector<2x8xf32>
    %274 = vector.shape_cast %273 : vector<2x8xf32> to vector<2x8x1xf32>
    %275 = vector.broadcast %274 : vector<2x8x1xf32> to vector<2x8x8xf32>
    %276 = arith.divf %272, %275 : vector<2x8x8xf32>
    "tpu.trace_start"() <{level = 10 : i32, message = "bqk,bkd->bqd"}> : () -> ()
    %cst_88 = arith.constant dense<0.000000e+00> : vector<2x8x8xf32>
    %277 = tpu.matmul %276, %265, %cst_88 {dimension_numbers = #tpu.dot_dimension_numbers<[2], [1], [1], [2], [0, 0, 0, 1, 1, 2], [0], [0]>} : vector<2x8x8xf32>, vector<2x8x8xf32>, vector<2x8x8xf32> -> vector<2x8x8xf32>
    "tpu.trace_stop"() : () -> ()
    %278 = vector.shape_cast %277 : vector<2x8x8xf32> to vector<16x8xf32>
    %279 = vector.extract_strided_slice %206 {offsets = [8, 0], sizes = [8, 32], strides = [1, 1]} : vector<160x32xf32> to vector<8x32xf32>
    %cst_89 = arith.constant dense<0.000000e+00> : vector<16x32xf32>
    %280 = tpu.matmul %278, %279, %cst_89 {dimension_numbers = #tpu.dot_dimension_numbers<[1], [0], [0], [1], [0, 0, 1, 1], [], []>} : vector<16x8xf32>, vector<8x32xf32>, vector<16x32xf32> -> vector<16x32xf32>
    %281 = arith.addf %259, %280 : vector<16x32xf32>
    %282 = vector.extract_strided_slice %236 {offsets = [0, 16], sizes = [16, 8], strides = [1, 1]} : vector<16x96xf32> to vector<16x8xf32>
    %283 = vector.shape_cast %282 : vector<16x8xf32> to vector<2x8x8xf32>
    %284 = vector.extract_strided_slice %236 {offsets = [0, 48], sizes = [16, 8], strides = [1, 1]} : vector<16x96xf32> to vector<16x8xf32>
    %285 = vector.shape_cast %284 : vector<16x8xf32> to vector<2x8x8xf32>
    %286 = vector.extract_strided_slice %236 {offsets = [0, 80], sizes = [16, 8], strides = [1, 1]} : vector<16x96xf32> to vector<16x8xf32>
    %287 = vector.shape_cast %286 : vector<16x8xf32> to vector<2x8x8xf32>
    "tpu.trace_start"() <{level = 10 : i32, message = "bqd,bkd->bqk"}> : () -> ()
    %cst_90 = arith.constant dense<0.000000e+00> : vector<2x8x8xf32>
    %288 = tpu.matmul %283, %285, %cst_90 {dimension_numbers = #tpu.dot_dimension_numbers<[2], [2], [1], [1], [0, 0, 0, 1, 1, 1], [0], [0]>} : vector<2x8x8xf32>, vector<2x8x8xf32>, vector<2x8x8xf32> -> vector<2x8x8xf32>
    "tpu.trace_stop"() : () -> ()
    %289 = arith.addf %288, %26 : vector<2x8x8xf32>
    %cst_91 = arith.constant dense<0xFF800000> : vector<2x8xf32>
    %290 = vector.multi_reduction <maximumf>, %289, %cst_91 [2] : vector<2x8x8xf32> to vector<2x8xf32>
    %291 = vector.shape_cast %290 : vector<2x8xf32> to vector<2x8x1xf32>
    %292 = vector.broadcast %291 : vector<2x8x1xf32> to vector<2x8x8xf32>
    %293 = arith.subf %289, %292 : vector<2x8x8xf32>
    %294 = math.exp %293 : vector<2x8x8xf32>
    %cst_92 = arith.constant dense<0.000000e+00> : vector<2x8xf32>
    %295 = vector.multi_reduction <add>, %294, %cst_92 [2] : vector<2x8x8xf32> to vector<2x8xf32>
    %296 = vector.shape_cast %295 : vector<2x8xf32> to vector<2x8x1xf32>
    %297 = vector.broadcast %296 : vector<2x8x1xf32> to vector<2x8x8xf32>
    %298 = arith.divf %294, %297 : vector<2x8x8xf32>
    "tpu.trace_start"() <{level = 10 : i32, message = "bqk,bkd->bqd"}> : () -> ()
    %cst_93 = arith.constant dense<0.000000e+00> : vector<2x8x8xf32>
    %299 = tpu.matmul %298, %287, %cst_93 {dimension_numbers = #tpu.dot_dimension_numbers<[2], [1], [1], [2], [0, 0, 0, 1, 1, 2], [0], [0]>} : vector<2x8x8xf32>, vector<2x8x8xf32>, vector<2x8x8xf32> -> vector<2x8x8xf32>
    "tpu.trace_stop"() : () -> ()
    %300 = vector.shape_cast %299 : vector<2x8x8xf32> to vector<16x8xf32>
    %301 = vector.extract_strided_slice %206 {offsets = [16, 0], sizes = [8, 32], strides = [1, 1]} : vector<160x32xf32> to vector<8x32xf32>
    %cst_94 = arith.constant dense<0.000000e+00> : vector<16x32xf32>
    %302 = tpu.matmul %300, %301, %cst_94 {dimension_numbers = #tpu.dot_dimension_numbers<[1], [0], [0], [1], [0, 0, 1, 1], [], []>} : vector<16x8xf32>, vector<8x32xf32>, vector<16x32xf32> -> vector<16x32xf32>
    %303 = arith.addf %281, %302 : vector<16x32xf32>
    %304 = vector.extract_strided_slice %236 {offsets = [0, 24], sizes = [16, 8], strides = [1, 1]} : vector<16x96xf32> to vector<16x8xf32>
    %305 = vector.shape_cast %304 : vector<16x8xf32> to vector<2x8x8xf32>
    %306 = vector.extract_strided_slice %236 {offsets = [0, 56], sizes = [16, 8], strides = [1, 1]} : vector<16x96xf32> to vector<16x8xf32>
    %307 = vector.shape_cast %306 : vector<16x8xf32> to vector<2x8x8xf32>
    %308 = vector.extract_strided_slice %236 {offsets = [0, 88], sizes = [16, 8], strides = [1, 1]} : vector<16x96xf32> to vector<16x8xf32>
    %309 = vector.shape_cast %308 : vector<16x8xf32> to vector<2x8x8xf32>
    "tpu.trace_start"() <{level = 10 : i32, message = "bqd,bkd->bqk"}> : () -> ()
    %cst_95 = arith.constant dense<0.000000e+00> : vector<2x8x8xf32>
    %310 = tpu.matmul %305, %307, %cst_95 {dimension_numbers = #tpu.dot_dimension_numbers<[2], [2], [1], [1], [0, 0, 0, 1, 1, 1], [0], [0]>} : vector<2x8x8xf32>, vector<2x8x8xf32>, vector<2x8x8xf32> -> vector<2x8x8xf32>
    "tpu.trace_stop"() : () -> ()
    %311 = arith.addf %310, %26 : vector<2x8x8xf32>
    %cst_96 = arith.constant dense<0xFF800000> : vector<2x8xf32>
    %312 = vector.multi_reduction <maximumf>, %311, %cst_96 [2] : vector<2x8x8xf32> to vector<2x8xf32>
    %313 = vector.shape_cast %312 : vector<2x8xf32> to vector<2x8x1xf32>
    %314 = vector.broadcast %313 : vector<2x8x1xf32> to vector<2x8x8xf32>
    %315 = arith.subf %311, %314 : vector<2x8x8xf32>
    %316 = math.exp %315 : vector<2x8x8xf32>
    %cst_97 = arith.constant dense<0.000000e+00> : vector<2x8xf32>
    %317 = vector.multi_reduction <add>, %316, %cst_97 [2] : vector<2x8x8xf32> to vector<2x8xf32>
    %318 = vector.shape_cast %317 : vector<2x8xf32> to vector<2x8x1xf32>
    %319 = vector.broadcast %318 : vector<2x8x1xf32> to vector<2x8x8xf32>
    %320 = arith.divf %316, %319 : vector<2x8x8xf32>
    "tpu.trace_start"() <{level = 10 : i32, message = "bqk,bkd->bqd"}> : () -> ()
    %cst_98 = arith.constant dense<0.000000e+00> : vector<2x8x8xf32>
    %321 = tpu.matmul %320, %309, %cst_98 {dimension_numbers = #tpu.dot_dimension_numbers<[2], [1], [1], [2], [0, 0, 0, 1, 1, 2], [0], [0]>} : vector<2x8x8xf32>, vector<2x8x8xf32>, vector<2x8x8xf32> -> vector<2x8x8xf32>
    "tpu.trace_stop"() : () -> ()
    %322 = vector.shape_cast %321 : vector<2x8x8xf32> to vector<16x8xf32>
    %323 = vector.extract_strided_slice %206 {offsets = [24, 0], sizes = [8, 32], strides = [1, 1]} : vector<160x32xf32> to vector<8x32xf32>
    %cst_99 = arith.constant dense<0.000000e+00> : vector<16x32xf32>
    %324 = tpu.matmul %322, %323, %cst_99 {dimension_numbers = #tpu.dot_dimension_numbers<[1], [0], [0], [1], [0, 0, 1, 1], [], []>} : vector<16x8xf32>, vector<8x32xf32>, vector<16x32xf32> -> vector<16x32xf32>
    %325 = arith.addf %303, %324 : vector<16x32xf32>
    %326 = arith.addf %202, %325 : vector<16x32xf32>
    %327 = vector.extract_strided_slice %204 {offsets = [1, 0], sizes = [1, 32], strides = [1, 1]} : vector<4x128xf32> to vector<1x32xf32>
    %328 = vector.broadcast %327 : vector<1x32xf32> to vector<16x32xf32>
    %329 = arith.addf %326, %328 : vector<16x32xf32>
    %c3 = arith.constant 3 : index
    %c0_100 = arith.constant 0 : index
    %c0_101 = arith.constant 0 : index
    %330 = vector.load %arg5[%c3, %c0_100, %c0_101] : memref<5x2x32xf32, #tpu.memory_space<vmem>>, vector<1x2x32xf32>
    %331 = vector.shape_cast %330 : vector<1x2x32xf32> to vector<2x32xf32>
    %cst_102 = arith.constant dense<0.000000e+00> : vector<16xf32>
    %332 = vector.multi_reduction <add>, %329, %cst_102 [1] : vector<16x32xf32> to vector<16xf32>
    %333 = vector.shape_cast %332 : vector<16xf32> to vector<16x1xf32>
    %cst_103 = arith.constant 3.200000e+01 : f32
    %334 = vector.broadcast %cst_103 : f32 to vector<16x1xf32>
    %335 = arith.divf %333, %334 : vector<16x1xf32>
    %336 = vector.broadcast %335 : vector<16x1xf32> to vector<16x32xf32>
    %337 = arith.subf %329, %336 : vector<16x32xf32>
    %338 = arith.mulf %337, %337 : vector<16x32xf32>
    %cst_104 = arith.constant dense<0.000000e+00> : vector<16xf32>
    %339 = vector.multi_reduction <add>, %338, %cst_104 [1] : vector<16x32xf32> to vector<16xf32>
    %340 = vector.shape_cast %339 : vector<16xf32> to vector<16x1xf32>
    %cst_105 = arith.constant 3.200000e+01 : f32
    %341 = vector.broadcast %cst_105 : f32 to vector<16x1xf32>
    %342 = arith.divf %340, %341 : vector<16x1xf32>
    %cst_106 = arith.constant 9.99999974E-6 : f32
    %343 = vector.broadcast %cst_106 : f32 to vector<16x1xf32>
    %344 = arith.addf %342, %343 : vector<16x1xf32>
    %345 = math.rsqrt %344 : vector<16x1xf32>
    %346 = vector.broadcast %345 : vector<16x1xf32> to vector<16x32xf32>
    %347 = arith.mulf %337, %346 : vector<16x32xf32>
    %348 = vector.extract_strided_slice %331 {offsets = [0, 0], sizes = [1, 32], strides = [1, 1]} : vector<2x32xf32> to vector<1x32xf32>
    %349 = vector.broadcast %348 : vector<1x32xf32> to vector<16x32xf32>
    %350 = arith.mulf %347, %349 : vector<16x32xf32>
    %351 = vector.extract_strided_slice %331 {offsets = [1, 0], sizes = [1, 32], strides = [1, 1]} : vector<2x32xf32> to vector<1x32xf32>
    %352 = vector.broadcast %351 : vector<1x32xf32> to vector<16x32xf32>
    %353 = arith.addf %350, %352 : vector<16x32xf32>
    %c1_107 = arith.constant 1 : index
    %c0_108 = arith.constant 0 : index
    %c0_109 = arith.constant 0 : index
    %354 = vector.load %arg7[%c1_107, %c0_108, %c0_109] : memref<2x32x128xf32, #tpu.memory_space<vmem>>, vector<1x32x128xf32>
    %355 = vector.shape_cast %354 : vector<1x32x128xf32> to vector<32x128xf32>
    %cst_110 = arith.constant dense<0.000000e+00> : vector<16x128xf32>
    %356 = tpu.matmul %353, %355, %cst_110 {dimension_numbers = #tpu.dot_dimension_numbers<[1], [0], [0], [1], [0, 0, 1, 1], [], []>} : vector<16x32xf32>, vector<32x128xf32>, vector<16x128xf32> -> vector<16x128xf32>
    %357 = vector.extract_strided_slice %204 {offsets = [2, 0], sizes = [1, 128], strides = [1, 1]} : vector<4x128xf32> to vector<1x128xf32>
    %358 = vector.broadcast %357 : vector<1x128xf32> to vector<16x128xf32>
    %359 = arith.addf %356, %358 : vector<16x128xf32>
    %360 = arith.mulf %359, %359 : vector<16x128xf32>
    %361 = arith.mulf %359, %360 : vector<16x128xf32>
    %cst_111 = arith.constant 4.471500e-02 : f32
    %362 = vector.broadcast %cst_111 : f32 to vector<16x128xf32>
    %363 = arith.mulf %362, %361 : vector<16x128xf32>
    %364 = arith.addf %359, %363 : vector<16x128xf32>
    %cst_112 = arith.constant 0.797884583 : f32
    %365 = vector.broadcast %cst_112 : f32 to vector<16x128xf32>
    %366 = arith.mulf %365, %364 : vector<16x128xf32>
    %367 = math.tanh %366 : vector<16x128xf32>
    %cst_113 = arith.constant 1.000000e+00 : f32
    %368 = vector.broadcast %cst_113 : f32 to vector<16x128xf32>
    %369 = arith.addf %368, %367 : vector<16x128xf32>
    %cst_114 = arith.constant 5.000000e-01 : f32
    %370 = vector.broadcast %cst_114 : f32 to vector<16x128xf32>
    %371 = arith.mulf %370, %369 : vector<16x128xf32>
    %372 = arith.mulf %359, %371 : vector<16x128xf32>
    %373 = vector.extract_strided_slice %206 {offsets = [32, 0], sizes = [128, 32], strides = [1, 1]} : vector<160x32xf32> to vector<128x32xf32>
    %cst_115 = arith.constant dense<0.000000e+00> : vector<16x32xf32>
    %374 = tpu.matmul %372, %373, %cst_115 {dimension_numbers = #tpu.dot_dimension_numbers<[1], [0], [0], [1], [0, 0, 1, 1], [], []>} : vector<16x128xf32>, vector<128x32xf32>, vector<16x32xf32> -> vector<16x32xf32>
    %375 = arith.addf %329, %374 : vector<16x32xf32>
    %376 = vector.extract_strided_slice %204 {offsets = [3, 0], sizes = [1, 32], strides = [1, 1]} : vector<4x128xf32> to vector<1x32xf32>
    %377 = vector.broadcast %376 : vector<1x32xf32> to vector<16x32xf32>
    %378 = arith.addf %375, %377 : vector<16x32xf32>
    %c4 = arith.constant 4 : index
    %c0_116 = arith.constant 0 : index
    %c0_117 = arith.constant 0 : index
    %379 = vector.load %arg5[%c4, %c0_116, %c0_117] : memref<5x2x32xf32, #tpu.memory_space<vmem>>, vector<1x2x32xf32>
    %380 = vector.shape_cast %379 : vector<1x2x32xf32> to vector<2x32xf32>
    %cst_118 = arith.constant dense<0.000000e+00> : vector<16xf32>
    %381 = vector.multi_reduction <add>, %378, %cst_118 [1] : vector<16x32xf32> to vector<16xf32>
    %382 = vector.shape_cast %381 : vector<16xf32> to vector<16x1xf32>
    %cst_119 = arith.constant 3.200000e+01 : f32
    %383 = vector.broadcast %cst_119 : f32 to vector<16x1xf32>
    %384 = arith.divf %382, %383 : vector<16x1xf32>
    %385 = vector.broadcast %384 : vector<16x1xf32> to vector<16x32xf32>
    %386 = arith.subf %378, %385 : vector<16x32xf32>
    %387 = arith.mulf %386, %386 : vector<16x32xf32>
    %cst_120 = arith.constant dense<0.000000e+00> : vector<16xf32>
    %388 = vector.multi_reduction <add>, %387, %cst_120 [1] : vector<16x32xf32> to vector<16xf32>
    %389 = vector.shape_cast %388 : vector<16xf32> to vector<16x1xf32>
    %cst_121 = arith.constant 3.200000e+01 : f32
    %390 = vector.broadcast %cst_121 : f32 to vector<16x1xf32>
    %391 = arith.divf %389, %390 : vector<16x1xf32>
    %cst_122 = arith.constant 9.99999974E-6 : f32
    %392 = vector.broadcast %cst_122 : f32 to vector<16x1xf32>
    %393 = arith.addf %391, %392 : vector<16x1xf32>
    %394 = math.rsqrt %393 : vector<16x1xf32>
    %395 = vector.broadcast %394 : vector<16x1xf32> to vector<16x32xf32>
    %396 = arith.mulf %386, %395 : vector<16x32xf32>
    %397 = vector.extract_strided_slice %380 {offsets = [0, 0], sizes = [1, 32], strides = [1, 1]} : vector<2x32xf32> to vector<1x32xf32>
    %398 = vector.broadcast %397 : vector<1x32xf32> to vector<16x32xf32>
    %399 = arith.mulf %396, %398 : vector<16x32xf32>
    %400 = vector.extract_strided_slice %380 {offsets = [1, 0], sizes = [1, 32], strides = [1, 1]} : vector<2x32xf32> to vector<1x32xf32>
    %401 = vector.broadcast %400 : vector<1x32xf32> to vector<16x32xf32>
    %402 = arith.addf %399, %401 : vector<16x32xf32>
    %403 = vector.shape_cast %402 : vector<16x32xf32> to vector<2x8x32xf32>
    %404 = vector.extract_strided_slice %403 {offsets = [0, 7, 0], sizes = [2, 1, 32], strides = [1, 1, 1]} : vector<2x8x32xf32> to vector<2x1x32xf32>
    %405 = vector.shape_cast %404 : vector<2x1x32xf32> to vector<2x32xf32>
    %c0_123 = arith.constant 0 : index
    %c0_124 = arith.constant 0 : index
    %406 = vector.load %arg10[%c0_123, %c0_124] : memref<48x8xf32, #tpu.memory_space<vmem>>, vector<48x8xf32>
    %c0_125 = arith.constant 0 : index
    %c0_126 = arith.constant 0 : index
    %407 = vector.load %arg11[%c0_125, %c0_126] : memref<2x8xf32, #tpu.memory_space<vmem>>, vector<2x8xf32>
    %c0_127 = arith.constant 0 : index
    %c0_128 = arith.constant 0 : index
    %408 = vector.load %arg12[%c0_127, %c0_128] : memref<16x1xf32, #tpu.memory_space<vmem>>, vector<16x1xf32>
    %409 = vector.extract_strided_slice %406 {offsets = [0, 0], sizes = [32, 8], strides = [1, 1]} : vector<48x8xf32> to vector<32x8xf32>
    %cst_129 = arith.constant dense<0.000000e+00> : vector<2x8xf32>
    %410 = tpu.matmul %405, %409, %cst_129 {dimension_numbers = #tpu.dot_dimension_numbers<[1], [0], [0], [1], [0, 0, 1, 1], [], []>} : vector<2x32xf32>, vector<32x8xf32>, vector<2x8xf32> -> vector<2x8xf32>
    %411 = vector.extract_strided_slice %407 {offsets = [0, 0], sizes = [1, 8], strides = [1, 1]} : vector<2x8xf32> to vector<1x8xf32>
    %412 = vector.broadcast %411 : vector<1x8xf32> to vector<2x8xf32>
    %413 = arith.addf %410, %412 : vector<2x8xf32>
    %c0_130 = arith.constant 0 : index
    %c0_131 = arith.constant 0 : index
    %414 = vector.load %arg2[%c0_130, %c0_131] : memref<2x16xf32, #tpu.memory_space<vmem>>, vector<2x16xf32>
    %415 = vector.extract_strided_slice %406 {offsets = [32, 0], sizes = [16, 8], strides = [1, 1]} : vector<48x8xf32> to vector<16x8xf32>
    %cst_132 = arith.constant dense<0.000000e+00> : vector<2x8xf32>
    %416 = tpu.matmul %414, %415, %cst_132 {dimension_numbers = #tpu.dot_dimension_numbers<[1], [0], [0], [1], [0, 0, 1, 1], [], []>} : vector<2x16xf32>, vector<16x8xf32>, vector<2x8xf32> -> vector<2x8xf32>
    %417 = vector.extract_strided_slice %407 {offsets = [1, 0], sizes = [1, 8], strides = [1, 1]} : vector<2x8xf32> to vector<1x8xf32>
    %418 = vector.broadcast %417 : vector<1x8xf32> to vector<2x8xf32>
    %419 = arith.addf %416, %418 : vector<2x8xf32>
    %cst_133 = arith.constant 0.000000e+00 : f32
    %420 = vector.broadcast %cst_133 : f32 to vector<2x8xf32>
    %421 = arith.maximumf %419, %420 : vector<2x8xf32>
    %422 = vector.extract_strided_slice %408 {offsets = [0, 0], sizes = [8, 1], strides = [1, 1]} : vector<16x1xf32> to vector<8x1xf32>
    %cst_134 = arith.constant dense<0.000000e+00> : vector<2x1xf32>
    %423 = tpu.matmul %413, %422, %cst_134 {dimension_numbers = #tpu.dot_dimension_numbers<[1], [0], [0], [1], [0, 0, 1, 1], [], []>} : vector<2x8xf32>, vector<8x1xf32>, vector<2x1xf32> -> vector<2x1xf32>
    %424 = vector.extract_strided_slice %408 {offsets = [8, 0], sizes = [8, 1], strides = [1, 1]} : vector<16x1xf32> to vector<8x1xf32>
    %cst_135 = arith.constant dense<0.000000e+00> : vector<2x1xf32>
    %425 = tpu.matmul %421, %424, %cst_135 {dimension_numbers = #tpu.dot_dimension_numbers<[1], [0], [0], [1], [0, 0, 1, 1], [], []>} : vector<2x8xf32>, vector<8x1xf32>, vector<2x1xf32> -> vector<2x1xf32>
    %426 = arith.addf %423, %425 : vector<2x1xf32>
    %c0_136 = arith.constant 0 : index
    %c0_137 = arith.constant 0 : index
    %427 = vector.load %arg13[%c0_136, %c0_137] : memref<1x1xf32, #tpu.memory_space<vmem>>, vector<1x1xf32>
    %428 = vector.broadcast %427 : vector<1x1xf32> to vector<2x1xf32>
    %429 = arith.addf %426, %428 : vector<2x1xf32>
    %430 = arith.negf %429 : vector<2x1xf32>
    %431 = math.exp %430 : vector<2x1xf32>
    %cst_138 = arith.constant 1.000000e+00 : f32
    %432 = vector.broadcast %cst_138 : f32 to vector<2x1xf32>
    %433 = arith.addf %432, %431 : vector<2x1xf32>
    %434 = arith.divf %432, %433 : vector<2x1xf32>
    %c0_139 = arith.constant 0 : index
    %c0_140 = arith.constant 0 : index
    %435 = vector.load %arg3[%c0_139, %c0_140] : memref<2x1xf32, #tpu.memory_space<vmem>>, vector<2x1xf32>
    %436 = math.log %434 : vector<2x1xf32>
    %cst_141 = arith.constant -1.000000e+02 : f32
    %437 = vector.broadcast %cst_141 : f32 to vector<2x1xf32>
    %438 = arith.maximumf %436, %437 : vector<2x1xf32>
    %cst_142 = arith.constant 1.000000e+00 : f32
    %439 = vector.broadcast %cst_142 : f32 to vector<2x1xf32>
    %440 = arith.subf %439, %434 : vector<2x1xf32>
    %441 = math.log %440 : vector<2x1xf32>
    %cst_143 = arith.constant -1.000000e+02 : f32
    %442 = vector.broadcast %cst_143 : f32 to vector<2x1xf32>
    %443 = arith.maximumf %441, %442 : vector<2x1xf32>
    %444 = arith.mulf %435, %438 : vector<2x1xf32>
    %cst_144 = arith.constant 1.000000e+00 : f32
    %445 = vector.broadcast %cst_144 : f32 to vector<2x1xf32>
    %446 = arith.subf %445, %435 : vector<2x1xf32>
    %447 = arith.mulf %446, %443 : vector<2x1xf32>
    %448 = arith.addf %444, %447 : vector<2x1xf32>
    %cst_145 = arith.constant 0.000000e+00 : f32
    %449 = vector.broadcast %cst_145 : f32 to vector<2x1xf32>
    %450 = arith.subf %449, %448 : vector<2x1xf32>
    %451 = vector.shape_cast %450 : vector<2x1xf32> to vector<1x2x1xf32>
    %cst_146 = arith.constant dense<0.000000e+00> : vector<1xf32>
    %452 = vector.multi_reduction <add>, %451, %cst_146 [1, 2] : vector<1x2x1xf32> to vector<1xf32>
    %453 = vector.shape_cast %452 : vector<1xf32> to vector<1x1x1xf32>
    %454 = vector.extract %453[0, 0, 0] : f32 from vector<1x1x1xf32>
    %455 = vector.broadcast %454 : f32 to vector<1x1xf32>
    %cst_147 = arith.constant 2.000000e+00 : f32
    %456 = vector.broadcast %cst_147 : f32 to vector<1x1xf32>
    %457 = arith.divf %455, %456 : vector<1x1xf32>
    %458 = vector.shape_cast %457 : vector<1x1xf32> to vector<1x1xf32>
    %459 = vector.broadcast %458 : vector<1x1xf32> to vector<2x1xf32>
    %cst_148 = arith.constant 0.000000e+00 : f32
    %460 = vector.broadcast %cst_148 : f32 to vector<2x125xf32>
    %461 = tpu.concatenate %429, %434, %459, %460 in 1 : vector<2x1xf32>, vector<2x1xf32>, vector<2x1xf32>, vector<2x125xf32> -> vector<2x128xf32>
    %cst_149 = arith.constant 0.000000e+00 : f32
    %462 = vector.broadcast %cst_149 : f32 to vector<6x128xf32>
    %463 = tpu.concatenate %461, %462 in 0 : vector<2x128xf32>, vector<6x128xf32> -> vector<8x128xf32>
    %c0_150 = arith.constant 0 : index
    %c0_151 = arith.constant 0 : index
    %464 = vector.load %arg14[%c0_150, %c0_151] : memref<8x128xf32, #tpu.memory_space<vmem>>, vector<8x128xf32>
    tpu.vector_store %arg14[%c0_150, %c0_151], %463 {strides = array<i32>} : memref<8x128xf32, #tpu.memory_space<vmem>>, vector<8x128xf32>,
    return
  }
}

</mosaic_0001>

<bundles_post_ra>
// kernel: forward.1
= control target key start
LH: loop header
LB: loop body
LE: loop exit
PB: predicated region body
PF: predicated region fallthrough
CT: control target
= control target key end

     0   :  { %v5480_v0 = vmov 0   ;;  %v5481_v5 = vmov 1   ;;  %v5482_v14 = vmov 0.0   ;;  %v51_v15 = vlaneseq  ;;  %s5484_s30 = smov 96   ;;  %s5488_s17 = smov 88   ;;  %s6327_s0 = inlined_call_operand.vmem [shape: s32[16,2], index: 0, kind: input, shape index: {}]   ;;  %s6328_s4 = inlined_call_operand.vmem [shape: f32[80,32], index: 4, kind: input, shape index: {}]   ;;  %s6329_s6 = inlined_call_operand.vmem [shape: f32[2,32,96], index: 6, kind: input, shape index: {}]   ;;  %s6330_s5 = inlined_call_operand.vmem [shape: f32[5,2,32], index: 5, kind: input, shape index: {}]   ;;  %s6331_s9 = inlined_call_operand.vmem [shape: f32[2,4,128], index: 9, kind: input, shape index: {}]   ;;  %s6332_s1 = inlined_call_operand.vmem [shape: s32[2,8], index: 1, kind: input, shape index: {}]   ;;  %s6333_s8 = inlined_call_operand.vmem [shape: f32[2,160,32], index: 8, kind: input, shape index: {}]   ;;  %s6334_s7 = inlined_call_operand.vmem [shape: f32[2,32,128], index: 7, kind: input, shape index: {}]   ;;  %s6335_s10 = inlined_call_operand.vmem [shape: f32[48,8], index: 10, kind: input, shape index: {}]   ;;  %s6336_s2 = inlined_call_operand.vmem [shape: f32[2,16], index: 2, kind: input, shape index: {}]   ;;  %s6337_s12 = inlined_call_operand.vmem [shape: f32[16,1], index: 12, kind: input, shape index: {}]   ;;  %s6338_s11 = inlined_call_operand.vmem [shape: f32[2,8], index: 11, kind: input, shape index: {}]   ;;  %s6339_s13 = inlined_call_operand.<no memory space> [shape: f32[1,1], index: 13, kind: input, shape index: {}]   ;;  %s6340_s3 = inlined_call_operand.vmem [shape: f32[2,1], index: 3, kind: input, shape index: {}]   ;;  %s6341_s14 = inlined_call_operand.vmem [shape: f32[8,128], index: 14, kind: output, shape index: {}]  }
   0x1   :  { %5378 = vset.pattern.permute.xlu1 %v5480_v0  ;;  %5376 = vset.pattern.permute.xlu0 %v5480_v0  ;;  %v50_v1 = vld [vmem:[%s6327_s0 + $0x8] sm:$0xff]  ;;  %v49_v2 = vld [vmem:[%s6327_s0] sm:$0xff]  ;;  %v82_v6 = vld [vmem:[%s6328_s4 + $0x38] sm:$0xff]  ;;  %vm85_vm5 = vcmask 654336   ;;  %vm237_vm7 = vcmask 261120   ;;  %vm5483_vm8 = vmmov 0  }
   0x2   :  { %57 = vperm.xlu1 %5378, %v50_v1   ;;  %54 = vperm.xlu0 %5376, %v49_v2   ;;  %v84_v3 = vld [vmem:[%s6328_s4 + $0x48] sm:$0xff]  ;;  %v83_v4 = vld [vmem:[%s6328_s4 + $0x40] sm:$0xff]  ;;  %v81_v7 = vld [vmem:[%s6328_s4 + $0x30] sm:$0xff]  ;;  %v5612_v18 = vand.u32 127, %v51_v15  ;;  %v5645_v47 = vshrl.u32 %v51_v15, 7  ;;  %vm369_vm9 = vcmask 64512  }
   0x3   :  { %4991 = vmatprep.subr.mxu0 %v84_v3  ;;  %v80_v8 = vld [vmem:[%s6328_s4 + $0x28] sm:$0xff]  ;;  %v79_v9 = vld [vmem:[%s6328_s4 + $0x20] sm:$0xff]  ;;  %v78_v10 = vld [vmem:[%s6328_s4 + $0x18] sm:$0xff]  ;;  %s5489_s18 = smov 120   ;;  %s5490_s19 = smov 56  }
   0x4   :  { %4992 = vmatpush3.msra.mxu0 %v84_v3  ;;  %v77_v11 = vld [vmem:[%s6328_s4 + $0x10] sm:$0xff]  ;;  %v76_v12 = vld [vmem:[%s6328_s4 + $0x8] sm:$0xff]  ;;  %v75_v13 = vld [vmem:[%s6328_s4] sm:$0xff]  ;;  %v5648_v48 = vsub.s32 0, %v5645_v47  ;;  %v5655_v52 = vsub.s32 1, %v5645_v47  ;;  %vm171_vm14 = vcmp.le.s32.totalorder %v5612_v18, %v5645_v47  ;;  %s5491_s4 = smov 80  }
   0x5   :  { %4993 = vmatprep.subr.mxu0 %v83_v4  ;;  %v280_v37 = vld [vmem:[%s6329_s6 + $0x18] sm:$0xff]  ;;  %v279_v38 = vld [vmem:[%s6329_s6 + $0x10] sm:$0xff]  ;;  %v278_v39 = vld [vmem:[%s6329_s6 + $0x8] sm:$0xff]  ;;  %s5492_s20 = smov 112   ;;  %s5493_s24 = smov 48  }
   0x6   :  { %5379 = vset.pattern.permute.xlu1 %v5481_v5  ;;  %5377 = vset.pattern.permute.xlu0 %v5481_v5  ;;  %v277_v40 = vld [vmem:[%s6329_s6] sm:$0xff]  ;;  %s5494_s25 = smov 72   ;;  %s5495_s26 = smov 104  }
   0x7   :  { %65 = vperm.xlu1 %5379, %v50_v1   ;;  %62 = vperm.xlu0 %5377, %v49_v2   ;;  %v236_v49 = vld [vmem:[%s6330_s5] sm:$0x3]  ;;  %s5496_s29 = smov 40  }
   0x8   :  { %4994 = vmatpush3.msra.mxu0 %v83_v4  ;;  %5014 = vmatprep.subr.mxu1 %v280_v37  ;;  %v268_v51 = vrot.slane %v236_v49, %v5648_v48  ;;  %v274_v57 = vrot.slane %v236_v49, %v5655_v52  ;;  %v5667_v61 = vld [vmem:[%s6331_s9] sm:$0xf] }
   0x9   :  { %4995 = vmatprep.subr.mxu0 %v82_v6  ;;  %5015 = vmatpush3.msra.mxu1 %v280_v37  ;;  %v284_v62 = vrot.slane %v5667_v61, %v5648_v48 }
   0xa   :  { %4996 = vmatpush3.msra.mxu0 %v82_v6  ;;  %5016 = vmatprep.subr.mxu1 %v279_v38  ;;  %v5485_v6 = vmov 1966171168  }
   0xb   :  { %4997 = vmatprep.subr.mxu0 %v81_v7  ;;  %5017 = vmatpush3.msra.mxu1 %v279_v38 }
   0xc   :  { %4998 = vmatpush3.msra.mxu0 %v81_v7  ;;  %5018 = vmatprep.subr.mxu1 %v278_v39  ;;  %v174_v7 = vunpack.c.l.s4 %v5485_v6 }
   0xd   :  { %4999 = vmatprep.subr.mxu0 %v80_v8  ;;  %5019 = vmatpush3.msra.mxu1 %v278_v39 }
   0xe   :  { %5000 = vmatpush3.msra.mxu0 %v80_v8  ;;  %5020 = vmatprep.subr.mxu1 %v277_v40  ;;  %v167_v8 = vld [vmem:[%s6332_s1] sm:$0x3]  ;;  %s5487_s1 = smov 64  }
   0xf   :  { %5001 = vmatprep.subr.mxu0 %v79_v9  ;;  %5021 = vmatpush3.msra.mxu1 %v277_v40  ;;  %vm168_vm10 = vcmp.gt.s32.totalorder %v167_v8, 0 }
  0x10   :  { %5002 = vmatpush3.msra.mxu0 %v79_v9  ;;  %5025 = vmatprep.subr.mxu1 %v5482_v14  ;;  %v175_v9 = vunpack.c.0.s8 %v174_v7 }
  0x11   :  { %5003 = vmatprep.subr.mxu0 %v78_v10 }
  0x12   :  { %5004 = vmatpush3.msra.mxu0 %v78_v10  ;;  %v178_v10 = vsub.s32 %v175_v9, %v5645_v47 }
  0x13   :  { %5005 = vmatprep.subr.mxu0 %v77_v11 }
  0x14   :  { %5006 = vmatpush3.msra.mxu0 %v77_v11  ;;  %v172_v11 = vsel %vm168_vm10, 1, %v5480_v0 }
  0x15   :  { %5007 = vmatprep.subr.mxu0 %v76_v12 }
  0x16   :  { %5008 = vmatpush3.msra.mxu0 %v76_v12  ;;  %v179_v12 = vrot.slane %v172_v11, %v178_v10 }
  0x17   :  { %5009 = vmatprep.subr.mxu0 %v75_v13 }
  0x18   :  { %5010 = vmatpush3.msra.mxu0 %v75_v13  ;;  %v180_v13 = vcombine.high %v179_v12, %v179_v12  ;;  %v187_v15 = vrot.slane %v179_v12, %v178_v10 }
  0x19   :  { %5050 = vmatprep.subr.mxu0 %v5482_v14 }
  0x1a   :  { %vm195_vm11 = vcmp.ne.s32.totalorder %v187_v15, 0 }
  0x7d   :  { %v55_v16 = vpop.permute.xlu0 %54  ;;  %v58_v17 = vpop.permute.xlu1 %57 }
  0x7e   :  { %vm60_vm0 = vcmp.eq.s32.totalorder %v5612_v18, %v58_v17  ;;  %vm59_vm3 = vcmp.eq.s32.totalorder %v5612_v18, %v55_v16  ;;  %v194_v16 = vrot.slane %v180_v13, %v178_v10  ;;  %v199_v17 = vsel %vm195_vm11, 1, %v5480_v0 }
  0x80   :  { %vm196_vm12 = vcmp.ne.s32.totalorder %v194_v16, 0 }
  0x82   :  { %v66_v19 = vpop.permute.xlu1 %65  ;;  %v63_v20 = vpop.permute.xlu0 %62 }
  0x83   :  { %vm68_vm1 = vcmp.eq.s32.totalorder %v5612_v18, %v66_v19  ;;  %vm67_vm2 = vcmp.eq.s32.totalorder %v5612_v18, %v63_v20  ;;  %v204_v19 = vrot.slane %v199_v17, %v5648_v48  ;;  %v200_v20 = vsel %vm196_vm12, 1, %v5480_v0 }
  0x84   :  { %vm70_vm4 = vmor %vm60_vm0, %vm68_vm1 }
  0x85   :  { %vm69_vm6 = vmor %vm59_vm3, %vm67_vm2  ;;  %v4705_v21 = vsel %vm70_vm4, 1.0, %v5482_v14  ;;  %vm209_vm13 = vcmp.eq.s32.totalorder %v204_v19, 1  ;;  %vm4346_vm2 = vcmask 1041409   ;;  %vm4425_vm3 = vcmask 130048  }
  0x86   :  { %v4704_v22 = vsel %vm69_vm6, 1.0, %v5482_v14  ;;  %vm211_vm15 = vmand %vm171_vm14, %vm209_vm13  ;;  %vm4673_vm4 = vcmask 1024   ;;  %vm4693_vm6 = vcmask 15360  }
  0x87   :  { %5011 = vmatprep.mubr.msk.f32.mxu0 %vm85_vm5, %v4704_v22  ;;  %v5486_v22 = vmov -1e+30  }
  0x88   :  { %5012 = vmatmul.mubr.msk.f32.vlgmr.msra.gmra.mxu0 %vm85_vm5, %v4705_v21  ;;  %v208_v21 = vrot.slane %v200_v20, %v5648_v48  ;;  %vm4691_vm5 = vcmask 7168  }
  0x89   :  { %5052 = vmatprep.mubr.msk.f32.mxu0 %vm5483_vm8, %v5482_v14 }
  0x8a   :  { %vm210_vm0 = vcmp.eq.s32.totalorder %v208_v21, 1 }
  0x8b   :  { %vm212_vm1 = vmand %vm171_vm14, %vm210_vm0 }
 0x148   :  { %v5620_v23 = vpop.f32.mrf.mxu0 }
 0x149   :  { %v241_v24 = vsel %vm237_vm7, %v5620_v23, 0.0 }
 0x14a   :  { %242 = vadd.xlane.f32.xlu0 %v241_v24  ;;  %v5624_v25 = vpop.f32.mrf.mxu0  ;;  %v5702_v24 = vsel %vm211_vm15, 0.0, %v5486_v22 }
 0x14b   :  { %v238_v26 = vsel %vm237_vm7, %v5624_v25, 0.0 }
 0x14c   :  { %239 = vadd.xlane.f32.xlu1 %v238_v26 }
 0x1d3   :  { %v243_v27 = vpop.xlane.xlu0 %242 }
 0x1d4   :  { %v246_v28 = vmul.f32 0.03125, %v243_v27 }
 0x1d5   :  { %v240_v29 = vpop.xlane.xlu1 %239 }
 0x1d6   :  { %v248_v30 = vsub.f32 %v5620_v23, %v246_v28  ;;  %v245_v31 = vmul.f32 0.03125, %v240_v29  ;;  %v5705_v29 = vsel %vm212_vm1, 0.0, %v5486_v22 }
 0x1d8   :  { %v247_v32 = vsub.f32 %v5624_v25, %v245_v31  ;;  %v250_v33 = vmul.f32 %v248_v30, %v248_v30 }
 0x1da   :  { %v254_v34 = vsel %vm237_vm7, %v250_v33, 0.0  ;;  %v249_v35 = vmul.f32 %v247_v32, %v247_v32 }
 0x1db   :  { %255 = vadd.xlane.f32.xlu1 %v254_v34 }
 0x1dc   :  { %v251_v36 = vsel %vm237_vm7, %v249_v35, 0.0 }
 0x1dd   :  { %252 = vadd.xlane.f32.xlu0 %v251_v36 }
 0x264   :  { %v256_v41 = vpop.xlane.xlu1 %255 }
 0x265   :  { %v258_v42 = vmul.f32 0.03125, %v256_v41 }
 0x266   :  { %v253_v43 = vpop.xlane.xlu0 %252 }
 0x267   :  { %v260_v44 = vadd.f32 1e-05, %v258_v42  ;;  %v257_v45 = vmul.f32 0.03125, %v253_v43 }
 0x269   :  { %5380 = vrsqrt.f32 %v260_v44  ;;  %v259_v46 = vadd.f32 1e-05, %v257_v45 }
 0x26b   :  { %5382 = vrsqrt.f32 %v259_v46 }
 0x276   :  { %v5381_v50 = vpop.eup %5380 }
 0x277   :  { %v264_v53 = vmul.f32 %v5381_v50, %v248_v30 }
 0x278   :  { %v5383_v54 = vpop.eup %5382 }
 0x279   :  { %v263_v55 = vmul.f32 %v5383_v54, %v247_v32  ;;  %v270_v56 = vmul.f32 %v268_v51, %v264_v53 }
 0x27b   :  { %v269_v58 = vmul.f32 %v268_v51, %v263_v55  ;;  %v276_v60 = vadd.f32 %v274_v57, %v270_v56 }
 0x27d   :  { %v275_v59 = vadd.f32 %v274_v57, %v269_v58 }
 0x27f   :  { %5022 = vmatprep.mubr.msk.f32.mxu1 %vm237_vm7, %v275_v59 }
 0x280   :  { %5023 = vmatmul.mubr.msk.f32.vlgmr.msra.gmra.mxu1 %vm237_vm7, %v276_v60 }
 0x281   :  { %5027 = vmatprep.mubr.msk.f32.mxu1 %vm5483_vm8, %v5482_v14 }
 0x340   :  { %v5024_v63 = vpop.f32.mrf.mxu1 }
 0x341   :  { %v5671_v1 = vadd.f32 %v5024_v63, %v284_v62 }
 0x342   :  { %v357_v2 = vpop.f32.mrf.mxu1 }
 0x343   :  { %v5673_v3 = vadd.f32 %v357_v2, %v284_v62  ;;  %445 = vrot.lane.b32.xlu1 %v5671_v1, %s5484_s30 }
 0x345   :  { %367 = vrot.lane.b32.xlu0 %v5673_v3, %s5484_s30 }
 0x3b5   :  { %v446_v5 = vpop.permute.xlu1 %445 }
 0x3b7   :  { %v368_v4 = vpop.permute.xlu0 %367 }
 0x3b8   :  { %5026 = vmatpush3.xpose.msk.msra.mxu1 %vm369_vm9, %v368_v4 }
 0x3b9   :  { %5030 = vmatprep.subr.mxu1 %v5482_v14 }
 0x3bb   :  { %5028 = vmatmul.mubr.msk.f32.vlgmr.msra.gmra.mxu1 %vm369_vm9, %v5673_v3 }
 0x3bc   :  { %5031 = vmatpush3.xpose.msk.msra.mxu1 %vm369_vm9, %v446_v5  ;;  %5032 = vmatprep.mubr.msk.f32.mxu1 %vm5483_vm8, %v5482_v14 }
 0x3bd   :  { %5035 = vmatprep.subr.mxu1 %v5482_v14 }
 0x3bf   :  { %5033 = vmatmul.mubr.msk.f32.vlgmr.msra.gmra.mxu1 %vm369_vm9, %v5671_v1 }
 0x3c0   :  { %5037 = vmatprep.mubr.msk.f32.mxu1 %vm5483_vm8, %v5482_v14 }
 0x47b   :  { %v440_v26 = vpop.f32.mrf.mxu1 }
 0x47c   :  { %v441_v27 = vadd.f32 %v440_v26, %v5702_v24  ;;  %v216_v26 = vld [vmem:[%s6333_s8] sm:$0xff] }
 0x47d   :  { %v5029_v28 = vpop.f32.mrf.mxu1 }
 0x47e   :  { %v521_v0 = vsel %vm369_vm9, %v441_v27, -inf }
 0x47f   :  { %522 = vmax.xlane.f32.xlu1 %v521_v0  ;;  %v517_v30 = vpop.f32.mrf.mxu1 }
 0x480   :  { %v518_v31 = vadd.f32 %v517_v30, %v5705_v29 }
 0x481   :  { %v5034_v32 = vpop.f32.mrf.mxu1 }
 0x482   :  { %v524_v18 = vsel %vm369_vm9, %v518_v31, -inf }
 0x483   :  { %525 = vmax.xlane.f32.xlu0 %v524_v18 }
 0x490   :  { %619 = vrot.lane.b32.xlu1 %v5671_v1, %s5487_s1 }
 0x494   :  { %697 = vrot.lane.b32.xlu1 %v5673_v3, %s5488_s17 }
 0x508   :  { %v523_v33 = vpop.xlane.xlu1 %522 }
 0x509   :  { %v527_v34 = vsub.f32 %v441_v27, %v523_v33 }
 0x50b   :  { %v529_v35 = vmul.f32 1.442695, %v527_v34 }
 0x50c   :  { %v526_v36 = vpop.xlane.xlu0 %525  ;;  %v620_v43 = vpop.permute.xlu1 %619 }
 0x50d   :  { %5384 = vpow2.f32 %v529_v35  ;;  %v528_v37 = vsub.f32 %v518_v31, %v526_v36  ;;  %v217_v35 = vld [vmem:[%s6333_s8 + $0x8] sm:$0xff] }
 0x50f   :  { %v531_v38 = vmul.f32 1.442695, %v528_v37 }
 0x510   :  { %v698_v44 = vpop.permute.xlu1 %697 }
 0x511   :  { %5386 = vpow2.f32 %v531_v38 }
 0x51a   :  { %v5385_v39 = vpop.eup %5384 }
 0x51b   :  { %v533_v40 = vsel %vm369_vm9, %v5385_v39, 0.0 }
 0x51c   :  { %534 = vadd.xlane.f32.xlu0 %v533_v40 }
 0x51e   :  { %v5387_v41 = vpop.eup %5386 }
 0x51f   :  { %v536_v42 = vsel %vm369_vm9, %v5387_v41, 0.0 }
 0x520   :  { %537 = vadd.xlane.f32.xlu1 %v536_v42 }
 0x531   :  { %695 = vrot.lane.b32.xlu1 %v5673_v3, %s5489_s18 }
 0x532   :  { %543 = vrot.lane.b32.xlu0 %v5673_v3, %s5487_s1 }
 0x536   :  { %775 = vrot.lane.b32.xlu0 %v5671_v1, %s5488_s17 }
 0x53a   :  { %773 = vrot.lane.b32.xlu0 %v5671_v1, %s5489_s18 }
 0x5a5   :  { %v535_v45 = vpop.xlane.xlu0 %534 }
 0x5a6   :  { %5388 = vrcp.f32 %v535_v45 }
 0x5a9   :  { %v538_v46 = vpop.xlane.xlu1 %537  ;;  %v544_v49 = vpop.permute.xlu0 %543 }
 0x5aa   :  { %5390 = vrcp.f32 %v538_v46  ;;  %5036 = vmatpush3.msra.mxu1 %v544_v49 }
 0x5ab   :  { %5040 = vmatprep.subr.mxu1 %v5482_v14 }
 0x5ad   :  { %v776_v50 = vpop.permute.xlu0 %775  ;;  %v696_v57 = vpop.permute.xlu1 %695 }
 0x5ae   :  { %5051 = vmatpush3.xpose.msk.msra.mxu0 %vm369_vm9, %v776_v50 }
 0x5af   :  { %5060 = vmatprep.subr.mxu0 %v5482_v14 }
 0x5b1   :  { %v774_v51 = vpop.permute.xlu0 %773 }
 0x5b2   :  { %5053 = vmatmul.mubr.msk.f32.vlgmr.msra.gmra.mxu0 %vm369_vm9, %v774_v51 }
 0x5b3   :  { %v5389_v53 = vpop.eup %5388  ;;  %5062 = vmatprep.mubr.msk.f32.mxu0 %vm5483_vm8, %v5482_v14 }
 0x5b4   :  { %v540_v54 = vmul.f32 %v5389_v53, %v5385_v39 }
 0x5b6   :  { %5038 = vmatmul.mubr.msk.f32.vlgmr.msra.gmra.mxu1 %vm369_vm9, %v540_v54 }
 0x5b7   :  { %v5391_v55 = vpop.eup %5390  ;;  %5041 = vmatpush3.msra.mxu1 %v620_v43  ;;  %5042 = vmatprep.mubr.msk.f32.mxu1 %vm5483_vm8, %v5482_v14 }
 0x5b8   :  { %5045 = vmatprep.subr.mxu1 %v5482_v14  ;;  %v542_v56 = vmul.f32 %v5391_v55, %v5387_v41 }
 0x5ba   :  { %5043 = vmatmul.mubr.msk.f32.vlgmr.msra.gmra.mxu1 %vm369_vm9, %v542_v56 }
 0x5bb   :  { %5046 = vmatpush3.xpose.msk.msra.mxu1 %vm369_vm9, %v698_v44  ;;  %5047 = vmatprep.mubr.msk.f32.mxu1 %vm5483_vm8, %v5482_v14 }
 0x5bc   :  { %5055 = vmatprep.subr.mxu1 %v5482_v14 }
 0x5be   :  { %5048 = vmatmul.mubr.msk.f32.vlgmr.msra.gmra.mxu1 %vm369_vm9, %v696_v57 }
 0x5bf   :  { %5057 = vmatprep.mubr.msk.f32.mxu1 %vm5483_vm8, %v5482_v14 }
 0x672   :  { %v847_v58 = vpop.f32.mrf.mxu0 }
 0x673   :  { %v848_v59 = vadd.f32 %v847_v58, %v5705_v29 }
 0x674   :  { %v5054_v60 = vpop.f32.mrf.mxu0 }
 0x675   :  { %v854_v62 = vsel %vm369_vm9, %v848_v59, -inf }
 0x676   :  { %855 = vmax.xlane.f32.xlu0 %v854_v62  ;;  %v615_v63 = vpop.f32.mrf.mxu1 }
 0x678   :  { %v5039_v2 = vpop.f32.mrf.mxu1 }
 0x67a   :  { %v691_v4 = vpop.f32.mrf.mxu1 }
 0x67c   :  { %v5044_v5 = vpop.f32.mrf.mxu1 }
 0x67e   :  { %v769_v6 = vpop.f32.mrf.mxu1 }
 0x67f   :  { %v770_v7 = vadd.f32 %v769_v6, %v5702_v24 }
 0x680   :  { %v5049_v8 = vpop.f32.mrf.mxu1 }
 0x681   :  { %v851_v9 = vsel %vm369_vm9, %v770_v7, -inf }
 0x682   :  { %852 = vmax.xlane.f32.xlu1 %v851_v9 }
 0x6ff   :  { %v856_v10 = vpop.xlane.xlu0 %855 }
 0x700   :  { %v858_v11 = vsub.f32 %v848_v59, %v856_v10 }
 0x702   :  { %v861_v12 = vmul.f32 1.442695, %v858_v11 }
 0x704   :  { %5392 = vpow2.f32 %v861_v12 }
 0x70b   :  { %v853_v13 = vpop.xlane.xlu1 %852 }
 0x70c   :  { %v857_v15 = vsub.f32 %v770_v7, %v853_v13 }
 0x70e   :  { %v859_v16 = vmul.f32 1.442695, %v857_v15 }
 0x710   :  { %5394 = vpow2.f32 %v859_v16 }
 0x711   :  { %v5393_v17 = vpop.eup %5392 }
 0x712   :  { %v866_v19 = vsel %vm369_vm9, %v5393_v17, 0.0 }
 0x713   :  { %867 = vadd.xlane.f32.xlu1 %v866_v19 }
 0x71d   :  { %v5395_v20 = vpop.eup %5394 }
 0x71e   :  { %v863_v21 = vsel %vm369_vm9, %v5395_v20, 0.0 }
 0x71f   :  { %864 = vadd.xlane.f32.xlu0 %v863_v21 }
 0x724   :  { %949 = vrot.lane.b32.xlu1 %v5671_v1, %s5490_s19 }
 0x728   :  { %1189 = vrot.lane.b32.xlu1 %v5673_v3, %s5491_s4 }
 0x72c   :  { %1187 = vrot.lane.b32.xlu1 %v5673_v3, %s5492_s20 }
 0x735   :  { %873 = vrot.lane.b32.xlu0 %v5673_v3, %s5490_s19 }
 0x739   :  { %1267 = vrot.lane.b32.xlu0 %v5671_v1, %s5491_s4 }
 0x73d   :  { %1265 = vrot.lane.b32.xlu0 %v5671_v1, %s5492_s20 }
 0x79c   :  { %v868_v22 = vpop.xlane.xlu1 %867 }
 0x79d   :  { %5396 = vrcp.f32 %v868_v22 }
 0x7a0   :  { %v950_v27 = vpop.permute.xlu1 %949 }
 0x7a1   :  { %5061 = vmatpush3.msra.mxu0 %v950_v27 }
 0x7a2   :  { %5070 = vmatprep.subr.mxu0 %v216_v26 }
 0x7a4   :  { %v1190_v43 = vpop.permute.xlu1 %1189 }
 0x7a8   :  { %v865_v28 = vpop.xlane.xlu0 %864  ;;  %v1188_v49 = vpop.permute.xlu1 %1187 }
 0x7a9   :  { %5398 = vrcp.f32 %v865_v28  ;;  %v218_v28 = vld [vmem:[%s6333_s8 + $0x10] sm:$0xff] }
 0x7aa   :  { %v5397_v0 = vpop.eup %5396 }
 0x7ab   :  { %v872_v30 = vmul.f32 %v5397_v0, %v5393_v17 }
 0x7ac   :  { %v874_v31 = vpop.permute.xlu0 %873 }
 0x7ad   :  { %5056 = vmatpush3.msra.mxu1 %v874_v31  ;;  %5063 = vmatmul.mubr.msk.f32.vlgmr.msra.gmra.mxu0 %vm369_vm9, %v872_v30 }
 0x7ae   :  { %5072 = vmatprep.mubr.msk.f32.mxu0 %vm369_vm9, %v615_v63  ;;  %5071 = vmatpush3.msra.mxu0 %v216_v26 }
 0x7af   :  { %5080 = vmatprep.subr.mxu0 %v5482_v14  ;;  %5065 = vmatprep.subr.mxu1 %v217_v35 }
 0x7b0   :  { %v1268_v32 = vpop.permute.xlu0 %1267 }
 0x7b1   :  { %5073 = vmatmul.mubr.msk.f32.vlgmr.msra.gmra.mxu0 %vm369_vm9, %v691_v4 }
 0x7b2   :  { %5081 = vmatpush3.xpose.msk.msra.mxu0 %vm369_vm9, %v1268_v32  ;;  %5082 = vmatprep.mubr.msk.f32.mxu0 %vm5483_vm8, %v5482_v14 }
 0x7b3   :  { %5090 = vmatprep.subr.mxu0 %v5482_v14 }
 0x7b4   :  { %v1266_v18 = vpop.permute.xlu0 %1265 }
 0x7b5   :  { %5083 = vmatmul.mubr.msk.f32.vlgmr.msra.gmra.mxu0 %vm369_vm9, %v1266_v18 }
 0x7b6   :  { %v5399_v33 = vpop.eup %5398  ;;  %5092 = vmatprep.mubr.msk.f32.mxu0 %vm5483_vm8, %v5482_v14 }
 0x7b7   :  { %v870_v34 = vmul.f32 %v5399_v33, %v5395_v20 }
 0x7b9   :  { %5058 = vmatmul.mubr.msk.f32.vlgmr.msra.gmra.mxu1 %vm369_vm9, %v870_v34 }
 0x7ba   :  { %5066 = vmatpush3.msra.mxu1 %v217_v35 }
 0x7bb   :  { %5075 = vmatprep.subr.mxu1 %v5482_v14 }
 0x86d   :  { %v1021_v36 = vpop.f32.mrf.mxu0 }
 0x86f   :  { %v5064_v37 = vpop.f32.mrf.mxu0 }
 0x871   :  { %v5779_v38 = vpop.f32.mrf.mxu0 }
 0x873   :  { %v5781_v39 = vpop.f32.mrf.mxu0 }
 0x875   :  { %v1339_v40 = vpop.f32.mrf.mxu0 }
 0x876   :  { %v1340_v41 = vadd.f32 %v1339_v40, %v5705_v29 }
 0x877   :  { %v5084_v42 = vpop.f32.mrf.mxu0 }
 0x878   :  { %v1346_v44 = vsel %vm369_vm9, %v1340_v41, -inf }
 0x879   :  { %1347 = vmax.xlane.f32.xlu0 %v1346_v44  ;;  %v945_v45 = vpop.f32.mrf.mxu1 }
 0x87a   :  { %5067 = vmatprep.mubr.msk.f32.mxu1 %vm369_vm9, %v945_v45 }
 0x87b   :  { %v5059_v46 = vpop.f32.mrf.mxu1  ;;  %5068 = vmatmul.mubr.msk.f32.vlgmr.msra.gmra.mxu1 %vm369_vm9, %v1021_v36 }
 0x87c   :  { %5076 = vmatpush3.xpose.msk.msra.mxu1 %vm369_vm9, %v1190_v43  ;;  %5077 = vmatprep.mubr.msk.f32.mxu1 %vm5483_vm8, %v5482_v14 }
 0x87d   :  { %5085 = vmatprep.subr.mxu1 %v5482_v14 }
 0x87f   :  { %5078 = vmatmul.mubr.msk.f32.vlgmr.msra.gmra.mxu1 %vm369_vm9, %v1188_v49 }
 0x880   :  { %5087 = vmatprep.mubr.msk.f32.mxu1 %vm5483_vm8, %v5482_v14 }
 0x902   :  { %v1348_v50 = vpop.xlane.xlu0 %1347 }
 0x903   :  { %v1350_v51 = vsub.f32 %v1340_v41, %v1348_v50 }
 0x905   :  { %v1353_v53 = vmul.f32 1.442695, %v1350_v51 }
 0x907   :  { %5400 = vpow2.f32 %v1353_v53 }
 0x914   :  { %v5401_v60 = vpop.eup %5400 }
 0x915   :  { %v1358_v62 = vsel %vm369_vm9, %v5401_v60, 0.0 }
 0x93b   :  { %v5794_v54 = vpop.f32.mrf.mxu1 }
 0x93c   :  { %v1184_v35 = vadd.f32 %v5779_v38, %v5794_v54 }
 0x93d   :  { %v5796_v55 = vpop.f32.mrf.mxu1 }
 0x93e   :  { %v1179_v37 = vadd.f32 %v5781_v39, %v5796_v55 }
 0x93f   :  { %v1261_v56 = vpop.f32.mrf.mxu1 }
 0x940   :  { %v1262_v57 = vadd.f32 %v1261_v56, %v5702_v24 }
 0x941   :  { %v5079_v58 = vpop.f32.mrf.mxu1 }
 0x942   :  { %v1343_v59 = vsel %vm369_vm9, %v1262_v57, -inf }
 0x943   :  { %1344 = vmax.xlane.f32.xlu1 %v1343_v59 }
 0x947   :  { %1359 = vadd.xlane.f32.xlu1 %v1358_v62 }
 0x958   :  { %1441 = vrot.lane.b32.xlu1 %v5671_v1, %s5493_s24 }
 0x95c   :  { %1602 = vrot.lane.b32.xlu1 %v5673_v3, %s5494_s25 }
 0x960   :  { %1600 = vrot.lane.b32.xlu1 %v5673_v3, %s5495_s26 }
 0x9cc   :  { %v1345_v63 = vpop.xlane.xlu1 %1344 }
 0x9cd   :  { %v1349_v2 = vsub.f32 %v1262_v57, %v1345_v63 }
 0x9cf   :  { %v1351_v4 = vmul.f32 1.442695, %v1349_v2 }
 0x9d0   :  { %v1360_v5 = vpop.xlane.xlu1 %1359 }
 0x9d1   :  { %5402 = vpow2.f32 %v1351_v4 }
 0x9d2   :  { %5404 = vrcp.f32 %v1360_v5 }
 0x9d4   :  { %v1442_v6 = vpop.permute.xlu1 %1441 }
 0x9d5   :  { %5091 = vmatpush3.msra.mxu0 %v1442_v6 }
 0x9d6   :  { %5100 = vmatprep.subr.mxu0 %v5482_v14 }
 0x9d8   :  { %v1603_v9 = vpop.permute.xlu1 %1602 }
 0x9dc   :  { %v1601_v12 = vpop.permute.xlu1 %1600 }
 0x9de   :  { %v5403_v7 = vpop.eup %5402 }
 0x9df   :  { %v5405_v8 = vpop.eup %5404  ;;  %v1355_v10 = vsel %vm369_vm9, %v5403_v7, 0.0 }
 0x9e0   :  { %1356 = vadd.xlane.f32.xlu0 %v1355_v10  ;;  %v1364_v11 = vmul.f32 %v5405_v8, %v5401_v60  ;;  %v2018_v8 = vrot.slane %v5667_v61, %v5655_v52 }
 0x9e2   :  { %5093 = vmatmul.mubr.msk.f32.vlgmr.msra.gmra.mxu0 %vm369_vm9, %v1364_v11 }
 0x9e3   :  { %5101 = vmatpush3.xpose.msk.msra.mxu0 %vm369_vm9, %v1603_v9  ;;  %5102 = vmatprep.mubr.msk.f32.mxu0 %vm5483_vm8, %v5482_v14 }
 0x9e4   :  { %5110 = vmatprep.subr.mxu0 %v5482_v14 }
 0x9e6   :  { %5103 = vmatmul.mubr.msk.f32.vlgmr.msra.gmra.mxu0 %vm369_vm9, %v1601_v12 }
 0x9e7   :  { %5112 = vmatprep.mubr.msk.f32.mxu0 %vm5483_vm8, %v5482_v14 }
 0x9f6   :  { %1365 = vrot.lane.b32.xlu0 %v5673_v3, %s5493_s24 }
 0x9fa   :  { %1680 = vrot.lane.b32.xlu0 %v5671_v1, %s5494_s25 }
 0x9fe   :  { %1678 = vrot.lane.b32.xlu0 %v5671_v1, %s5495_s26 }
 0xa69   :  { %v1357_v13 = vpop.xlane.xlu0 %1356 }
 0xa6a   :  { %5406 = vrcp.f32 %v1357_v13 }
 0xa6d   :  { %v1366_v15 = vpop.permute.xlu0 %1365 }
 0xa6e   :  { %5086 = vmatpush3.msra.mxu1 %v1366_v15 }
 0xa6f   :  { %5095 = vmatprep.subr.mxu1 %v218_v28 }
 0xa71   :  { %v1681_v0 = vpop.permute.xlu0 %1680 }
 0xa75   :  { %v1679_v32 = vpop.permute.xlu0 %1678 }
 0xa77   :  { %v5407_v16 = vpop.eup %5406 }
 0xa78   :  { %v1362_v17 = vmul.f32 %v5407_v16, %v5403_v7 }
 0xa7a   :  { %5088 = vmatmul.mubr.msk.f32.vlgmr.msra.gmra.mxu1 %vm369_vm9, %v1362_v17 }
 0xa7b   :  { %5096 = vmatpush3.msra.mxu1 %v218_v28 }
 0xa7c   :  { %5105 = vmatprep.subr.mxu1 %v5482_v14 }
 0xaa2   :  { %v1513_v19 = vpop.f32.mrf.mxu0 }
 0xaa4   :  { %v5094_v20 = vpop.f32.mrf.mxu0 }
 0xaa6   :  { %v1674_v21 = vpop.f32.mrf.mxu0 }
 0xaa7   :  { %v1675_v22 = vadd.f32 %v1674_v21, %v5702_v24 }
 0xaa8   :  { %v5104_v26 = vpop.f32.mrf.mxu0 }
 0xaa9   :  { %v1756_v27 = vsel %vm369_vm9, %v1675_v22, -inf }
 0xaaa   :  { %1757 = vmax.xlane.f32.xlu1 %v1756_v27 }
 0xb33   :  { %v1758_v18 = vpop.xlane.xlu1 %1757 }
 0xb34   :  { %v1762_v33 = vsub.f32 %v1675_v22, %v1758_v18  ;;  %v2061_v18 = vld [vmem:[%s6334_s7] sm:$0xff] }
 0xb36   :  { %v1764_v34 = vmul.f32 1.442695, %v1762_v33 }
 0xb38   :  { %5408 = vpow2.f32 %v1764_v34 }
 0xb3a   :  { %v1437_v30 = vpop.f32.mrf.mxu1 }
 0xb3b   :  { %5097 = vmatprep.mubr.msk.f32.mxu1 %vm369_vm9, %v1437_v30  ;;  %v2064_v30 = vld [vmem:[%s6334_s7 + $0x18] sm:$0xff] }
 0xb3c   :  { %v5089_v31 = vpop.f32.mrf.mxu1  ;;  %5098 = vmatmul.mubr.msk.f32.vlgmr.msra.gmra.mxu1 %vm369_vm9, %v1513_v19 }
 0xb3d   :  { %5106 = vmatpush3.xpose.msk.msra.mxu1 %vm369_vm9, %v1681_v0  ;;  %5107 = vmatprep.mubr.msk.f32.mxu1 %vm5483_vm8, %v5482_v14  ;;  %v2063_v31 = vld [vmem:[%s6334_s7 + $0x10] sm:$0xff] }
 0xb3e   :  { %5115 = vmatprep.subr.mxu1 %v5482_v14 }
 0xb40   :  { %5108 = vmatmul.mubr.msk.f32.vlgmr.msra.gmra.mxu1 %vm369_vm9, %v1679_v32  ;;  %v2062_v32 = vld [vmem:[%s6334_s7 + $0x8] sm:$0xff] }
 0xb41   :  { %5117 = vmatprep.mubr.msk.f32.mxu1 %vm5483_vm8, %v5482_v14 }
 0xb45   :  { %v5409_v49 = vpop.eup %5408 }
 0xb46   :  { %v1768_v50 = vsel %vm369_vm9, %v5409_v49, 0.0 }
 0xbfc   :  { %v5099_v36 = vpop.f32.mrf.mxu1 }
 0xbfd   :  { %v1599_v40 = vadd.f32 %v5099_v36, %v1184_v35 }
 0xbfe   :  { %v1589_v41 = vpop.f32.mrf.mxu1 }
 0xbff   :  { %v1598_v42 = vadd.f32 %v1589_v41, %v1179_v37  ;;  %v4742_v41 = vld [vmem:[%s6330_s5 + $0x2] sm:$0x3] }
 0xc00   :  { %v1752_v43 = vpop.f32.mrf.mxu1 }
 0xc01   :  { %v1753_v44 = vadd.f32 %v1752_v43, %v5705_v29  ;;  %v2052_v43 = vrot.slane %v4742_v41, %v5648_v48 }
 0xc02   :  { %v5109_v45 = vpop.f32.mrf.mxu1 }
 0xc03   :  { %v1759_v46 = vsel %vm369_vm9, %v1753_v44, -inf }
 0xc04   :  { %1760 = vmax.xlane.f32.xlu0 %v1759_v46 }
 0xc08   :  { %1769 = vadd.xlane.f32.xlu0 %v1768_v50  ;;  %v2058_v50 = vrot.slane %v4742_v41, %v5655_v52 }
 0xc1e   :  { %1778 = vrot.lane.b32.xlu0 %v5673_v3, %s5496_s29  ;;  %v219_v3 = vld [vmem:[%s6333_s8 + $0x18] sm:$0xff] }
 0xc8d   :  { %v1761_v38 = vpop.xlane.xlu0 %1760 }
 0xc8e   :  { %v1763_v39 = vsub.f32 %v1753_v44, %v1761_v38 }
 0xc90   :  { %v1766_v51 = vmul.f32 1.442695, %v1763_v39 }
 0xc91   :  { %v1770_v53 = vpop.xlane.xlu0 %1769 }
 0xc92   :  { %5410 = vpow2.f32 %v1766_v51 }
 0xc93   :  { %5412 = vrcp.f32 %v1770_v53  ;;  %v235_v53 = vld [vmem:[%s6333_s8 + $0x98] sm:$0xff] }
 0xc95   :  { %v1779_v54 = vpop.permute.xlu0 %1778 }
 0xc96   :  { %5111 = vmatpush3.msra.mxu0 %v1779_v54  ;;  %v234_v54 = vld [vmem:[%s6333_s8 + $0x90] sm:$0xff] }
 0xc97   :  { %5120 = vmatprep.subr.mxu0 %v219_v3 }
 0xc9f   :  { %v5411_v55 = vpop.eup %5410 }
 0xca0   :  { %v5413_v56 = vpop.eup %5412  ;;  %v1771_v57 = vsel %vm369_vm9, %v5411_v55, 0.0 }
 0xca1   :  { %1772 = vadd.xlane.f32.xlu1 %v1771_v57  ;;  %v1775_v58 = vmul.f32 %v5413_v56, %v5409_v49  ;;  %v232_v56 = vld [vmem:[%s6333_s8 + $0x80] sm:$0xff]  ;;  %v231_v57 = vld [vmem:[%s6333_s8 + $0x78] sm:$0xff] }
 0xca3   :  { %5113 = vmatmul.mubr.msk.f32.vlgmr.msra.gmra.mxu0 %vm369_vm9, %v1775_v58  ;;  %v230_v58 = vld [vmem:[%s6333_s8 + $0x70] sm:$0xff] }
 0xca4   :  { %5121 = vmatpush3.msra.mxu0 %v219_v3  ;;  %v229_v3 = vld [vmem:[%s6333_s8 + $0x68] sm:$0xff] }
 0xca5   :  { %5136 = vmatprep.subr.mxu0 %v235_v53 }
 0xcb2   :  { %1854 = vrot.lane.b32.xlu1 %v5671_v1, %s5496_s29 }
 0xd2a   :  { %v1773_v59 = vpop.xlane.xlu1 %1772 }
 0xd2b   :  { %5414 = vrcp.f32 %v1773_v59  ;;  %v228_v59 = vld [vmem:[%s6333_s8 + $0x60] sm:$0xff] }
 0xd2e   :  { %v1855_v60 = vpop.permute.xlu1 %1854 }
 0xd2f   :  { %5116 = vmatpush3.msra.mxu1 %v1855_v60  ;;  %v227_v60 = vld [vmem:[%s6333_s8 + $0x58] sm:$0xff] }
 0xd30   :  { %5125 = vmatprep.subr.mxu1 %v2064_v30 }
 0xd38   :  { %v5415_v62 = vpop.eup %5414 }
 0xd39   :  { %v1777_v63 = vmul.f32 %v5415_v62, %v5411_v55  ;;  %v233_v55 = vld [vmem:[%s6333_s8 + $0x88] sm:$0xff]  ;;  %v226_v62 = vld [vmem:[%s6333_s8 + $0x50] sm:$0xff] }
 0xd3b   :  { %5118 = vmatmul.mubr.msk.f32.vlgmr.msra.gmra.mxu1 %vm369_vm9, %v1777_v63  ;;  %v225_v63 = vld [vmem:[%s6333_s8 + $0x48] sm:$0xff] }
 0xd3c   :  { %5126 = vmatpush3.msra.mxu1 %v2064_v30 }
 0xd3d   :  { %5127 = vmatprep.subr.mxu1 %v2063_v31 }
 0xd3e   :  { %5128 = vmatpush3.msra.mxu1 %v2063_v31 }
 0xd3f   :  { %5129 = vmatprep.subr.mxu1 %v2062_v32 }
 0xd40   :  { %5130 = vmatpush3.msra.mxu1 %v2062_v32 }
 0xd41   :  { %5131 = vmatprep.subr.mxu1 %v2061_v18 }
 0xd42   :  { %5132 = vmatpush3.msra.mxu1 %v2061_v18 }
 0xd63   :  { %v1850_v2 = vpop.f32.mrf.mxu0 }
 0xd64   :  { %5122 = vmatprep.mubr.msk.f32.mxu0 %vm369_vm9, %v1850_v2  ;;  %v224_v2 = vld [vmem:[%s6333_s8 + $0x40] sm:$0xff] }
 0xd65   :  { %v5114_v4 = vpop.f32.mrf.mxu0 }
 0xd66   :  { %v223_v4 = vld [vmem:[%s6333_s8 + $0x38] sm:$0xff] }
 0xdfb   :  { %v1926_v5 = vpop.f32.mrf.mxu1 }
 0xdfc   :  { %5123 = vmatmul.mubr.msk.f32.vlgmr.msra.gmra.mxu0 %vm369_vm9, %v1926_v5  ;;  %v222_v5 = vld [vmem:[%s6333_s8 + $0x30] sm:$0xff] }
 0xdfd   :  { %v5119_v1 = vpop.f32.mrf.mxu1  ;;  %5137 = vmatpush3.msra.mxu0 %v235_v53 }
 0xdfe   :  { %5138 = vmatprep.subr.mxu0 %v234_v54  ;;  %v221_v1 = vld [vmem:[%s6333_s8 + $0x28] sm:$0xff] }
 0xdff   :  { %5139 = vmatpush3.msra.mxu0 %v234_v54 }
 0xe00   :  { %5140 = vmatprep.subr.mxu0 %v233_v55 }
 0xe01   :  { %5141 = vmatpush3.msra.mxu0 %v233_v55  ;;  %v4770_v55 = vld [vmem:[%s6329_s6 + $0x38] sm:$0xff] }
 0xe02   :  { %5142 = vmatprep.subr.mxu0 %v232_v56  ;;  %5171 = vmatprep.subr.mxu1 %v4770_v55 }
 0xe03   :  { %5143 = vmatpush3.msra.mxu0 %v232_v56  ;;  %v4769_v56 = vld [vmem:[%s6329_s6 + $0x30] sm:$0xff] }
 0xe04   :  { %5144 = vmatprep.subr.mxu0 %v231_v57 }
 0xe05   :  { %5145 = vmatpush3.msra.mxu0 %v231_v57  ;;  %v4768_v57 = vld [vmem:[%s6329_s6 + $0x28] sm:$0xff] }
 0xe06   :  { %5146 = vmatprep.subr.mxu0 %v230_v58 }
 0xe07   :  { %5147 = vmatpush3.msra.mxu0 %v230_v58  ;;  %v4767_v58 = vld [vmem:[%s6329_s6 + $0x20] sm:$0xff] }
 0xe08   :  { %5148 = vmatprep.subr.mxu0 %v229_v3 }
 0xe09   :  { %5149 = vmatpush3.msra.mxu0 %v229_v3 }
 0xe0a   :  { %5150 = vmatprep.subr.mxu0 %v228_v59 }
 0xe0b   :  { %5151 = vmatpush3.msra.mxu0 %v228_v59 }
 0xe0c   :  { %5152 = vmatprep.subr.mxu0 %v227_v60 }
 0xe0d   :  { %5153 = vmatpush3.msra.mxu0 %v227_v60 }
 0xe0e   :  { %5154 = vmatprep.subr.mxu0 %v226_v62 }
 0xe0f   :  { %5155 = vmatpush3.msra.mxu0 %v226_v62 }
 0xe10   :  { %5156 = vmatprep.subr.mxu0 %v225_v63 }
 0xe11   :  { %5157 = vmatpush3.msra.mxu0 %v225_v63 }
 0xe12   :  { %5158 = vmatprep.subr.mxu0 %v224_v2 }
 0xe13   :  { %5159 = vmatpush3.msra.mxu0 %v224_v2 }
 0xe14   :  { %5160 = vmatprep.subr.mxu0 %v223_v4 }
 0xe15   :  { %5161 = vmatpush3.msra.mxu0 %v223_v4  ;;  %v4766_v4 = vld [vmem:[%s6330_s5 + $0x4] sm:$0x3] }
 0xe16   :  { %5162 = vmatprep.subr.mxu0 %v222_v5 }
 0xe17   :  { %5163 = vmatpush3.msra.mxu0 %v222_v5 }
 0xe18   :  { %5164 = vmatprep.subr.mxu0 %v221_v1 }
 0xe19   :  { %5165 = vmatpush3.msra.mxu0 %v221_v1  ;;  %v2305_v1 = vrot.slane %v4766_v4, %v5648_v48 }
 0xebc   :  { %v5124_v6 = vpop.f32.mrf.mxu0 }
 0xebd   :  { %v2012_v7 = vadd.f32 %v5124_v6, %v1599_v40  ;;  %v220_v6 = vld [vmem:[%s6333_s8 + $0x20] sm:$0xff] }
 0xebe   :  { %v2002_v9 = vpop.f32.mrf.mxu0  ;;  %5166 = vmatprep.subr.mxu0 %v220_v6 }
 0xebf   :  { %v2014_v10 = vadd.f32 %v5620_v23, %v2012_v7  ;;  %v2011_v11 = vadd.f32 %v2002_v9, %v1598_v42  ;;  %5167 = vmatpush3.msra.mxu0 %v220_v6  ;;  %v2067_v7 = vsub.s32 2, %v5645_v47 }
 0xec0   :  { %5207 = vmatprep.subr.mxu0 %v5482_v14 }
 0xec1   :  { %v5861_v12 = vadd.f32 %v2018_v8, %v2014_v10  ;;  %v2013_v13 = vadd.f32 %v2011_v11, %v5624_v25 }
 0xec3   :  { %v5864_v15 = vadd.f32 %v2018_v8, %v2013_v13  ;;  %v2026_v16 = vsel %vm237_vm7, %v5861_v12, 0.0  ;;  %v2068_v8 = vrot.slane %v5667_v61, %v2067_v7 }
 0xec4   :  { %2027 = vadd.xlane.f32.xlu0 %v2026_v16 }
 0xec5   :  { %v2023_v17 = vsel %vm237_vm7, %v5864_v15, 0.0 }
 0xec6   :  { %2024 = vadd.xlane.f32.xlu1 %v2023_v17 }
 0xf4d   :  { %v2028_v19 = vpop.xlane.xlu0 %2027 }
 0xf4e   :  { %v2030_v20 = vmul.f32 0.03125, %v2028_v19 }
 0xf4f   :  { %v2025_v21 = vpop.xlane.xlu1 %2024 }
 0xf50   :  { %v2032_v23 = vsub.f32 %v5861_v12, %v2030_v20  ;;  %v2029_v22 = vmul.f32 0.03125, %v2025_v21 }
 0xf52   :  { %v2031_v26 = vsub.f32 %v5864_v15, %v2029_v22  ;;  %v2034_v27 = vmul.f32 %v2032_v23, %v2032_v23 }
 0xf54   :  { %v2038_v25 = vsel %vm237_vm7, %v2034_v27, 0.0  ;;  %v2033_v28 = vmul.f32 %v2031_v26, %v2031_v26 }
 0xf55   :  { %2039 = vadd.xlane.f32.xlu1 %v2038_v25 }
 0xf56   :  { %v2035_v0 = vsel %vm237_vm7, %v2033_v28, 0.0 }
 0xf57   :  { %2036 = vadd.xlane.f32.xlu0 %v2035_v0 }
 0xfde   :  { %v2040_v33 = vpop.xlane.xlu1 %2039 }
 0xfdf   :  { %v2042_v34 = vmul.f32 0.03125, %v2040_v33 }
 0xfe0   :  { %v2037_v35 = vpop.xlane.xlu0 %2036 }
 0xfe1   :  { %v2044_v36 = vadd.f32 1e-05, %v2042_v34  ;;  %v2041_v37 = vmul.f32 0.03125, %v2037_v35  ;;  %v2247_v35 = vsub.s32 3, %v5645_v47 }
 0xfe3   :  { %5416 = vrsqrt.f32 %v2044_v36  ;;  %v2043_v40 = vadd.f32 1e-05, %v2041_v37  ;;  %v2248_v36 = vrot.slane %v5667_v61, %v2247_v35 }
 0xfe5   :  { %5418 = vrsqrt.f32 %v2043_v40 }
 0xff0   :  { %v5417_v42 = vpop.eup %5416 }
 0xff1   :  { %v2048_v44 = vmul.f32 %v5417_v42, %v2032_v23 }
 0xff2   :  { %v5419_v45 = vpop.eup %5418 }
 0xff3   :  { %v2047_v46 = vmul.f32 %v5419_v45, %v2031_v26  ;;  %v2054_v49 = vmul.f32 %v2052_v43, %v2048_v44 }
 0xff5   :  { %v2053_v38 = vmul.f32 %v2052_v43, %v2047_v46  ;;  %v2060_v51 = vadd.f32 %v2058_v50, %v2054_v49 }
 0xff7   :  { %v2059_v39 = vadd.f32 %v2058_v50, %v2053_v38 }
 0xff9   :  { %5133 = vmatprep.mubr.msk.f32.mxu1 %vm237_vm7, %v2059_v39 }
 0xffa   :  { %5134 = vmatmul.mubr.msk.f32.vlgmr.msra.gmra.mxu1 %vm237_vm7, %v2060_v51 }
 0xffb   :  { %5172 = vmatpush3.msra.mxu1 %v4770_v55 }
 0xffc   :  { %5173 = vmatprep.subr.mxu1 %v4769_v56 }
 0xffd   :  { %5174 = vmatpush3.msra.mxu1 %v4769_v56 }
 0xffe   :  { %5175 = vmatprep.subr.mxu1 %v4768_v57 }
 0xfff   :  { %5176 = vmatpush3.msra.mxu1 %v4768_v57 }
0x1000   :  { %5177 = vmatprep.subr.mxu1 %v4767_v58 }
0x1001   :  { %5178 = vmatpush3.msra.mxu1 %v4767_v58 }
0x1002   :  { %5182 = vmatprep.subr.mxu1 %v5482_v14 }
0x10ba   :  { %v5135_v9 = vpop.f32.mrf.mxu1 }
0x10bb   :  { %v2147_v10 = vadd.f32 %v5135_v9, %v2068_v8 }
0x10bc   :  { %v2141_v11 = vpop.f32.mrf.mxu1 }
0x10bd   :  { %v2151_v13 = vmul.f32 %v2147_v10, %v2147_v10  ;;  %v2142_v16 = vadd.f32 %v2141_v11, %v2068_v8  ;;  %v2311_v11 = vrot.slane %v4766_v4, %v5655_v52 }
0x10bf   :  { %v2153_v17 = vmul.f32 %v2151_v13, %v2147_v10  ;;  %v2150_v19 = vmul.f32 %v2142_v16, %v2142_v16 }
0x10c1   :  { %v2155_v20 = vmul.f32 0.044715, %v2153_v17  ;;  %v2152_v21 = vmul.f32 %v2150_v19, %v2142_v16  ;;  %v5991_v19 = vld [vmem:[%s6331_s9 + $0x4] sm:$0xf] }
0x10c3   :  { %v2157_v23 = vadd.f32 %v2155_v20, %v2147_v10  ;;  %v2154_v22 = vmul.f32 0.044715, %v2152_v21  ;;  %v2322_v20 = vrot.slane %v5991_v19, %v5648_v48 }
0x10c5   :  { %v2159_v26 = vmul.f32 0.7978846, %v2157_v23  ;;  %v2156_v27 = vadd.f32 %v2154_v22, %v2142_v16 }
0x10c7   :  { %5420 = vtanh.f32 %v2159_v26  ;;  %v2158_v25 = vmul.f32 0.7978846, %v2156_v27 }
0x10c9   :  { %5422 = vtanh.f32 %v2158_v25 }
0x10d4   :  { %v5421_v28 = vpop.eup %5420 }
0x10d5   :  { %v2163_v0 = vadd.f32 1.0, %v5421_v28 }
0x10d6   :  { %v5423_v30 = vpop.eup %5422 }
0x10d7   :  { %v2162_v31 = vadd.f32 1.0, %v5423_v30  ;;  %v2165_v32 = vmul.f32 0.5, %v2163_v0 }
0x10d9   :  { %v2164_v18 = vmul.f32 0.5, %v2162_v31  ;;  %v2167_v34 = vmul.f32 %v2165_v32, %v2147_v10 }
0x10db   :  { %v2166_v33 = vmul.f32 %v2164_v18, %v2142_v16 }
0x10dd   :  { %5168 = vmatprep.mubr.f32.mxu0 %v2166_v33 }
0x10de   :  { %5169 = vmatmul.mubr.f32.vlgmr.msra.gmra.mxu0 %v2167_v34 }
0x10df   :  { %5209 = vmatprep.mubr.msk.f32.mxu0 %vm5483_vm8, %v5482_v14 }
0x119e   :  { %v5170_v37 = vpop.f32.mrf.mxu0 }
0x119f   :  { %v2244_v40 = vadd.f32 %v5170_v37, %v5861_v12 }
0x11a0   :  { %v2234_v41 = vpop.f32.mrf.mxu0 }
0x11a1   :  { %v5953_v42 = vadd.f32 %v2248_v36, %v2244_v40  ;;  %v2243_v43 = vadd.f32 %v2234_v41, %v5864_v15 }
0x11a3   :  { %v5956_v44 = vadd.f32 %v2248_v36, %v2243_v43  ;;  %v2279_v45 = vsel %vm237_vm7, %v5953_v42, 0.0 }
0x11a4   :  { %2280 = vadd.xlane.f32.xlu1 %v2279_v45 }
0x11a5   :  { %v2276_v46 = vsel %vm237_vm7, %v5956_v44, 0.0 }
0x11a6   :  { %2277 = vadd.xlane.f32.xlu0 %v2276_v46 }
0x122d   :  { %v2281_v49 = vpop.xlane.xlu1 %2280 }
0x122e   :  { %v2283_v61 = vmul.f32 0.03125, %v2281_v49 }
0x122f   :  { %v2278_v50 = vpop.xlane.xlu0 %2277 }
0x1230   :  { %v2285_v12 = vsub.f32 %v5953_v42, %v2283_v61  ;;  %v2282_v38 = vmul.f32 0.03125, %v2278_v50 }
0x1232   :  { %v2284_v39 = vsub.f32 %v5956_v44, %v2282_v38  ;;  %v2287_v51 = vmul.f32 %v2285_v12, %v2285_v12 }
0x1234   :  { %v2291_v15 = vsel %vm237_vm7, %v2287_v51, 0.0  ;;  %v2286_v53 = vmul.f32 %v2284_v39, %v2284_v39 }
0x1235   :  { %2292 = vadd.xlane.f32.xlu1 %v2291_v15 }
0x1236   :  { %v2288_v54 = vsel %vm237_vm7, %v2286_v53, 0.0 }
0x1237   :  { %2289 = vadd.xlane.f32.xlu0 %v2288_v54 }
0x12be   :  { %v2293_v3 = vpop.xlane.xlu1 %2292 }
0x12bf   :  { %v2295_v59 = vmul.f32 0.03125, %v2293_v3 }
0x12c0   :  { %v2290_v60 = vpop.xlane.xlu0 %2289 }
0x12c1   :  { %v2297_v62 = vadd.f32 1e-05, %v2295_v59  ;;  %v2294_v63 = vmul.f32 0.03125, %v2290_v60 }
0x12c3   :  { %5424 = vrsqrt.f32 %v2297_v62  ;;  %v2296_v2 = vadd.f32 1e-05, %v2294_v63 }
0x12c5   :  { %5426 = vrsqrt.f32 %v2296_v2 }
0x12d0   :  { %v5425_v5 = vpop.eup %5424 }
0x12d1   :  { %v2301_v6 = vmul.f32 %v5425_v5, %v2285_v12 }
0x12d2   :  { %v5427_v8 = vpop.eup %5426 }
0x12d3   :  { %v2300_v9 = vmul.f32 %v5427_v8, %v2284_v39  ;;  %v2307_v10 = vmul.f32 %v2305_v1, %v2301_v6 }
0x12d5   :  { %v2306_v13 = vmul.f32 %v2305_v1, %v2300_v9  ;;  %v2313_v17 = vadd.f32 %v2311_v11, %v2307_v10 }
0x12d7   :  { %v2312_v16 = vadd.f32 %v2311_v11, %v2306_v13 }
0x12d9   :  { %5179 = vmatprep.mubr.msk.f32.mxu1 %vm237_vm7, %v2312_v16 }
0x12da   :  { %5180 = vmatmul.mubr.msk.f32.vlgmr.msra.gmra.mxu1 %vm237_vm7, %v2313_v17 }
0x12db   :  { %5184 = vmatprep.mubr.msk.f32.mxu1 %vm5483_vm8, %v5482_v14 }
0x139a   :  { %v5181_v21 = vpop.f32.mrf.mxu1 }
0x139b   :  { %v5995_v23 = vadd.f32 %v5181_v21, %v2322_v20 }
0x139c   :  { %v2395_v22 = vpop.f32.mrf.mxu1 }
0x139d   :  { %v5997_v26 = vadd.f32 %v2395_v22, %v2322_v20  ;;  %2482 = vrot.lane.b32.xlu1 %v5995_v23, %s5484_s30 }
0x139f   :  { %2405 = vrot.lane.b32.xlu0 %v5997_v26, %s5484_s30 }
0x140f   :  { %v2483_v25 = vpop.permute.xlu1 %2482 }
0x1411   :  { %v2406_v27 = vpop.permute.xlu0 %2405 }
0x1412   :  { %5183 = vmatpush3.xpose.msk.msra.mxu1 %vm369_vm9, %v2406_v27 }
0x1413   :  { %5187 = vmatprep.subr.mxu1 %v5482_v14 }
0x1415   :  { %5185 = vmatmul.mubr.msk.f32.vlgmr.msra.gmra.mxu1 %vm369_vm9, %v5997_v26 }
0x1416   :  { %5188 = vmatpush3.xpose.msk.msra.mxu1 %vm369_vm9, %v2483_v25  ;;  %5189 = vmatprep.mubr.msk.f32.mxu1 %vm5483_vm8, %v5482_v14 }
0x1417   :  { %5192 = vmatprep.subr.mxu1 %v5482_v14 }
0x1419   :  { %5190 = vmatmul.mubr.msk.f32.vlgmr.msra.gmra.mxu1 %vm369_vm9, %v5995_v23 }
0x141a   :  { %5194 = vmatprep.mubr.msk.f32.mxu1 %vm5483_vm8, %v5482_v14 }
0x14d5   :  { %v2477_v28 = vpop.f32.mrf.mxu1 }
0x14d6   :  { %v2478_v0 = vadd.f32 %v2477_v28, %v5702_v24 }
0x14d7   :  { %v5186_v30 = vpop.f32.mrf.mxu1 }
0x14d8   :  { %v2558_v31 = vsel %vm369_vm9, %v2478_v0, -inf  ;;  %v4746_v30 = vld [vmem:[%s6333_s8 + $0xa0] sm:$0xff] }
0x14d9   :  { %2559 = vmax.xlane.f32.xlu1 %v2558_v31  ;;  %v2554_v32 = vpop.f32.mrf.mxu1 }
0x14da   :  { %v2555_v18 = vadd.f32 %v2554_v32, %v5705_v29 }
0x14db   :  { %v5191_v33 = vpop.f32.mrf.mxu1 }
0x14dc   :  { %v2561_v34 = vsel %vm369_vm9, %v2555_v18, -inf }
0x14dd   :  { %2562 = vmax.xlane.f32.xlu0 %v2561_v34 }
0x14ea   :  { %2656 = vrot.lane.b32.xlu1 %v5995_v23, %s5487_s1 }
0x14ee   :  { %2734 = vrot.lane.b32.xlu1 %v5997_v26, %s5488_s17 }
0x1562   :  { %v2560_v36 = vpop.xlane.xlu1 %2559 }
0x1563   :  { %v2564_v37 = vsub.f32 %v2478_v0, %v2560_v36 }
0x1565   :  { %v2566_v40 = vmul.f32 1.442695, %v2564_v37 }
0x1566   :  { %v2563_v41 = vpop.xlane.xlu0 %2562  ;;  %v2657_v12 = vpop.permute.xlu1 %2656 }
0x1567   :  { %5428 = vpow2.f32 %v2566_v40  ;;  %v2565_v43 = vsub.f32 %v2555_v18, %v2563_v41 }
0x1569   :  { %v2568_v45 = vmul.f32 1.442695, %v2565_v43  ;;  %v4747_v43 = vld [vmem:[%s6333_s8 + $0xa8] sm:$0xff] }
0x156a   :  { %v2735_v38 = vpop.permute.xlu1 %2734 }
0x156b   :  { %5430 = vpow2.f32 %v2568_v45 }
0x1574   :  { %v5429_v46 = vpop.eup %5428 }
0x1575   :  { %v2570_v49 = vsel %vm369_vm9, %v5429_v46, 0.0 }
0x1576   :  { %2571 = vadd.xlane.f32.xlu0 %v2570_v49 }
0x1578   :  { %v5431_v61 = vpop.eup %5430 }
0x1579   :  { %v2573_v50 = vsel %vm369_vm9, %v5431_v61, 0.0 }
0x157a   :  { %2574 = vadd.xlane.f32.xlu1 %v2573_v50 }
0x158b   :  { %2732 = vrot.lane.b32.xlu1 %v5997_v26, %s5489_s18 }
0x158c   :  { %2580 = vrot.lane.b32.xlu0 %v5997_v26, %s5487_s1 }
0x1590   :  { %2812 = vrot.lane.b32.xlu0 %v5995_v23, %s5488_s17 }
0x1594   :  { %2810 = vrot.lane.b32.xlu0 %v5995_v23, %s5489_s18 }
0x15ff   :  { %v2572_v39 = vpop.xlane.xlu0 %2571 }
0x1600   :  { %5432 = vrcp.f32 %v2572_v39 }
0x1603   :  { %v2575_v51 = vpop.xlane.xlu1 %2574  ;;  %v2581_v15 = vpop.permute.xlu0 %2580 }
0x1604   :  { %5434 = vrcp.f32 %v2575_v51  ;;  %5193 = vmatpush3.msra.mxu1 %v2581_v15 }
0x1605   :  { %5197 = vmatprep.subr.mxu1 %v5482_v14 }
0x1607   :  { %v2813_v53 = vpop.permute.xlu0 %2812  ;;  %v2733_v3 = vpop.permute.xlu1 %2732 }
0x1608   :  { %5208 = vmatpush3.xpose.msk.msra.mxu0 %vm369_vm9, %v2813_v53 }
0x1609   :  { %5217 = vmatprep.subr.mxu0 %v5482_v14 }
0x160b   :  { %v2811_v54 = vpop.permute.xlu0 %2810 }
0x160c   :  { %5210 = vmatmul.mubr.msk.f32.vlgmr.msra.gmra.mxu0 %vm369_vm9, %v2811_v54 }
0x160d   :  { %v5433_v55 = vpop.eup %5432  ;;  %5219 = vmatprep.mubr.msk.f32.mxu0 %vm5483_vm8, %v5482_v14 }
0x160e   :  { %v2577_v56 = vmul.f32 %v5433_v55, %v5429_v46 }
0x1610   :  { %5195 = vmatmul.mubr.msk.f32.vlgmr.msra.gmra.mxu1 %vm369_vm9, %v2577_v56 }
0x1611   :  { %v5435_v57 = vpop.eup %5434  ;;  %5198 = vmatpush3.msra.mxu1 %v2657_v12  ;;  %5199 = vmatprep.mubr.msk.f32.mxu1 %vm5483_vm8, %v5482_v14 }
0x1612   :  { %5202 = vmatprep.subr.mxu1 %v5482_v14  ;;  %v2579_v58 = vmul.f32 %v5435_v57, %v5431_v61 }
0x1614   :  { %5200 = vmatmul.mubr.msk.f32.vlgmr.msra.gmra.mxu1 %vm369_vm9, %v2579_v58 }
0x1615   :  { %5203 = vmatpush3.xpose.msk.msra.mxu1 %vm369_vm9, %v2735_v38  ;;  %5204 = vmatprep.mubr.msk.f32.mxu1 %vm5483_vm8, %v5482_v14 }
0x1616   :  { %5212 = vmatprep.subr.mxu1 %v5482_v14 }
0x1618   :  { %5205 = vmatmul.mubr.msk.f32.vlgmr.msra.gmra.mxu1 %vm369_vm9, %v2733_v3 }
0x1619   :  { %5214 = vmatprep.mubr.msk.f32.mxu1 %vm5483_vm8, %v5482_v14 }
0x16cc   :  { %v2884_v59 = vpop.f32.mrf.mxu0 }
0x16cd   :  { %v2885_v60 = vadd.f32 %v2884_v59, %v5705_v29 }
0x16ce   :  { %v5211_v62 = vpop.f32.mrf.mxu0 }
0x16cf   :  { %v2891_v63 = vsel %vm369_vm9, %v2885_v60, -inf }
0x16d0   :  { %2892 = vmax.xlane.f32.xlu0 %v2891_v63  ;;  %v2652_v2 = vpop.f32.mrf.mxu1 }
0x16d2   :  { %v5196_v4 = vpop.f32.mrf.mxu1 }
0x16d4   :  { %v2728_v5 = vpop.f32.mrf.mxu1 }
0x16d6   :  { %v5201_v1 = vpop.f32.mrf.mxu1 }
0x16d8   :  { %v2806_v6 = vpop.f32.mrf.mxu1 }
0x16d9   :  { %v2807_v8 = vadd.f32 %v2806_v6, %v5702_v24 }
0x16da   :  { %v5206_v9 = vpop.f32.mrf.mxu1 }
0x16db   :  { %v2888_v10 = vsel %vm369_vm9, %v2807_v8, -inf }
0x16dc   :  { %2889 = vmax.xlane.f32.xlu1 %v2888_v10 }
0x1759   :  { %v2893_v11 = vpop.xlane.xlu0 %2892 }
0x175a   :  { %v2895_v13 = vsub.f32 %v2885_v60, %v2893_v11 }
0x175c   :  { %v2898_v16 = vmul.f32 1.442695, %v2895_v13 }
0x175e   :  { %5436 = vpow2.f32 %v2898_v16 }
0x1765   :  { %v2890_v17 = vpop.xlane.xlu1 %2889 }
0x1766   :  { %v2894_v20 = vsub.f32 %v2807_v8, %v2890_v17 }
0x1768   :  { %v2896_v21 = vmul.f32 1.442695, %v2894_v20 }
0x176a   :  { %5438 = vpow2.f32 %v2896_v21 }
0x176b   :  { %v5437_v22 = vpop.eup %5436 }
0x176c   :  { %v2903_v27 = vsel %vm369_vm9, %v5437_v22, 0.0 }
0x176d   :  { %2904 = vadd.xlane.f32.xlu1 %v2903_v27 }
0x1777   :  { %v5439_v25 = vpop.eup %5438 }
0x1778   :  { %v2900_v28 = vsel %vm369_vm9, %v5439_v25, 0.0 }
0x1779   :  { %2901 = vadd.xlane.f32.xlu0 %v2900_v28 }
0x177e   :  { %2986 = vrot.lane.b32.xlu1 %v5995_v23, %s5490_s19 }
0x1782   :  { %3226 = vrot.lane.b32.xlu1 %v5997_v26, %s5491_s4 }
0x1786   :  { %3224 = vrot.lane.b32.xlu1 %v5997_v26, %s5492_s20 }
0x178f   :  { %2910 = vrot.lane.b32.xlu0 %v5997_v26, %s5490_s19 }
0x1793   :  { %3304 = vrot.lane.b32.xlu0 %v5995_v23, %s5491_s4 }
0x1797   :  { %3302 = vrot.lane.b32.xlu0 %v5995_v23, %s5492_s20 }
0x17f6   :  { %v2905_v0 = vpop.xlane.xlu1 %2904 }
0x17f7   :  { %5440 = vrcp.f32 %v2905_v0 }
0x17fa   :  { %v2987_v31 = vpop.permute.xlu1 %2986 }
0x17fb   :  { %5218 = vmatpush3.msra.mxu0 %v2987_v31 }
0x17fc   :  { %5227 = vmatprep.subr.mxu0 %v4746_v30 }
0x17fe   :  { %v3227_v39 = vpop.permute.xlu1 %3226 }
0x1802   :  { %v2902_v32 = vpop.xlane.xlu0 %2901  ;;  %v3225_v54 = vpop.permute.xlu1 %3224 }
0x1803   :  { %5442 = vrcp.f32 %v2902_v32 }
0x1804   :  { %v5441_v18 = vpop.eup %5440 }
0x1805   :  { %v2909_v33 = vmul.f32 %v5441_v18, %v5437_v22 }
0x1806   :  { %v2911_v34 = vpop.permute.xlu0 %2910 }
0x1807   :  { %5213 = vmatpush3.msra.mxu1 %v2911_v34  ;;  %5220 = vmatmul.mubr.msk.f32.vlgmr.msra.gmra.mxu0 %vm369_vm9, %v2909_v33  ;;  %v4748_v33 = vld [vmem:[%s6333_s8 + $0xb0] sm:$0xff] }
0x1808   :  { %5229 = vmatprep.mubr.msk.f32.mxu0 %vm369_vm9, %v2652_v2  ;;  %5228 = vmatpush3.msra.mxu0 %v4746_v30 }
0x1809   :  { %5237 = vmatprep.subr.mxu0 %v5482_v14  ;;  %5222 = vmatprep.subr.mxu1 %v4747_v43 }
0x180a   :  { %v3305_v36 = vpop.permute.xlu0 %3304 }
0x180b   :  { %5230 = vmatmul.mubr.msk.f32.vlgmr.msra.gmra.mxu0 %vm369_vm9, %v2728_v5 }
0x180c   :  { %5238 = vmatpush3.xpose.msk.msra.mxu0 %vm369_vm9, %v3305_v36  ;;  %5239 = vmatprep.mubr.msk.f32.mxu0 %vm5483_vm8, %v5482_v14 }
0x180d   :  { %5247 = vmatprep.subr.mxu0 %v5482_v14 }
0x180e   :  { %v3303_v37 = vpop.permute.xlu0 %3302 }
0x180f   :  { %5240 = vmatmul.mubr.msk.f32.vlgmr.msra.gmra.mxu0 %vm369_vm9, %v3303_v37 }
0x1810   :  { %v5443_v40 = vpop.eup %5442  ;;  %5249 = vmatprep.mubr.msk.f32.mxu0 %vm5483_vm8, %v5482_v14 }
0x1811   :  { %v2907_v41 = vmul.f32 %v5443_v40, %v5439_v25 }
0x1813   :  { %5215 = vmatmul.mubr.msk.f32.vlgmr.msra.gmra.mxu1 %vm369_vm9, %v2907_v41 }
0x1814   :  { %5223 = vmatpush3.msra.mxu1 %v4747_v43 }
0x1815   :  { %5232 = vmatprep.subr.mxu1 %v5482_v14 }
0x18c7   :  { %v3058_v45 = vpop.f32.mrf.mxu0 }
0x18c9   :  { %v5221_v46 = vpop.f32.mrf.mxu0 }
0x18cb   :  { %v6088_v49 = vpop.f32.mrf.mxu0 }
0x18cd   :  { %v6090_v61 = vpop.f32.mrf.mxu0 }
0x18cf   :  { %v3376_v50 = vpop.f32.mrf.mxu0 }
0x18d0   :  { %v3377_v12 = vadd.f32 %v3376_v50, %v5705_v29 }
0x18d1   :  { %v5241_v38 = vpop.f32.mrf.mxu0 }
0x18d2   :  { %v3383_v51 = vsel %vm369_vm9, %v3377_v12, -inf }
0x18d3   :  { %3384 = vmax.xlane.f32.xlu0 %v3383_v51  ;;  %v2982_v15 = vpop.f32.mrf.mxu1 }
0x18d4   :  { %5224 = vmatprep.mubr.msk.f32.mxu1 %vm369_vm9, %v2982_v15 }
0x18d5   :  { %v5216_v53 = vpop.f32.mrf.mxu1  ;;  %5225 = vmatmul.mubr.msk.f32.vlgmr.msra.gmra.mxu1 %vm369_vm9, %v3058_v45 }
0x18d6   :  { %5233 = vmatpush3.xpose.msk.msra.mxu1 %vm369_vm9, %v3227_v39  ;;  %5234 = vmatprep.mubr.msk.f32.mxu1 %vm5483_vm8, %v5482_v14 }
0x18d7   :  { %5242 = vmatprep.subr.mxu1 %v5482_v14 }
0x18d9   :  { %5235 = vmatmul.mubr.msk.f32.vlgmr.msra.gmra.mxu1 %vm369_vm9, %v3225_v54 }
0x18da   :  { %5244 = vmatprep.mubr.msk.f32.mxu1 %vm5483_vm8, %v5482_v14 }
0x195c   :  { %v3385_v55 = vpop.xlane.xlu0 %3384 }
0x195d   :  { %v3387_v56 = vsub.f32 %v3377_v12, %v3385_v55 }
0x195f   :  { %v3390_v57 = vmul.f32 1.442695, %v3387_v56 }
0x1961   :  { %5444 = vpow2.f32 %v3390_v57 }
0x196e   :  { %v5445_v2 = vpop.eup %5444 }
0x196f   :  { %v3395_v4 = vsel %vm369_vm9, %v5445_v2, 0.0 }
0x1995   :  { %v6103_v58 = vpop.f32.mrf.mxu1 }
0x1996   :  { %v3221_v45 = vadd.f32 %v6088_v49, %v6103_v58 }
0x1997   :  { %v6105_v3 = vpop.f32.mrf.mxu1 }
0x1998   :  { %v3216_v50 = vadd.f32 %v6090_v61, %v6105_v3 }
0x1999   :  { %v3298_v59 = vpop.f32.mrf.mxu1 }
0x199a   :  { %v3299_v60 = vadd.f32 %v3298_v59, %v5702_v24 }
0x199b   :  { %v5236_v62 = vpop.f32.mrf.mxu1 }
0x199c   :  { %v3380_v63 = vsel %vm369_vm9, %v3299_v60, -inf }
0x199d   :  { %3381 = vmax.xlane.f32.xlu1 %v3380_v63 }
0x19a1   :  { %3396 = vadd.xlane.f32.xlu1 %v3395_v4 }
0x19b2   :  { %3478 = vrot.lane.b32.xlu1 %v5995_v23, %s5493_s24 }
0x19b6   :  { %3639 = vrot.lane.b32.xlu1 %v5997_v26, %s5494_s25 }
0x19ba   :  { %3637 = vrot.lane.b32.xlu1 %v5997_v26, %s5495_s26 }
0x1a26   :  { %v3382_v5 = vpop.xlane.xlu1 %3381 }
0x1a27   :  { %v3386_v1 = vsub.f32 %v3299_v60, %v3382_v5 }
0x1a29   :  { %v3388_v6 = vmul.f32 1.442695, %v3386_v1 }
0x1a2a   :  { %v3397_v8 = vpop.xlane.xlu1 %3396 }
0x1a2b   :  { %5446 = vpow2.f32 %v3388_v6 }
0x1a2c   :  { %5448 = vrcp.f32 %v3397_v8 }
0x1a2e   :  { %v3479_v9 = vpop.permute.xlu1 %3478 }
0x1a2f   :  { %5248 = vmatpush3.msra.mxu0 %v3479_v9 }
0x1a30   :  { %5257 = vmatprep.subr.mxu0 %v5482_v14 }
0x1a32   :  { %v3640_v13 = vpop.permute.xlu1 %3639 }
0x1a36   :  { %v3638_v20 = vpop.permute.xlu1 %3637 }
0x1a38   :  { %v5447_v10 = vpop.eup %5446 }
0x1a39   :  { %v5449_v11 = vpop.eup %5448  ;;  %v3392_v16 = vsel %vm369_vm9, %v5447_v10, 0.0 }
0x1a3a   :  { %3393 = vadd.xlane.f32.xlu0 %v3392_v16  ;;  %v3401_v17 = vmul.f32 %v5449_v11, %v5445_v2  ;;  %v4055_v11 = vrot.slane %v5991_v19, %v5655_v52 }
0x1a3c   :  { %5250 = vmatmul.mubr.msk.f32.vlgmr.msra.gmra.mxu0 %vm369_vm9, %v3401_v17 }
0x1a3d   :  { %5258 = vmatpush3.xpose.msk.msra.mxu0 %vm369_vm9, %v3640_v13  ;;  %5259 = vmatprep.mubr.msk.f32.mxu0 %vm5483_vm8, %v5482_v14 }
0x1a3e   :  { %5267 = vmatprep.subr.mxu0 %v5482_v14 }
0x1a40   :  { %5260 = vmatmul.mubr.msk.f32.vlgmr.msra.gmra.mxu0 %vm369_vm9, %v3638_v20 }
0x1a41   :  { %5269 = vmatprep.mubr.msk.f32.mxu0 %vm5483_vm8, %v5482_v14 }
0x1a50   :  { %3402 = vrot.lane.b32.xlu0 %v5997_v26, %s5493_s24 }
0x1a54   :  { %3717 = vrot.lane.b32.xlu0 %v5995_v23, %s5494_s25 }
0x1a58   :  { %3715 = vrot.lane.b32.xlu0 %v5995_v23, %s5495_s26 }
0x1ac3   :  { %v3394_v21 = vpop.xlane.xlu0 %3393 }
0x1ac4   :  { %5450 = vrcp.f32 %v3394_v21 }
0x1ac7   :  { %v3403_v22 = vpop.permute.xlu0 %3402 }
0x1ac8   :  { %5243 = vmatpush3.msra.mxu1 %v3403_v22 }
0x1ac9   :  { %5252 = vmatprep.subr.mxu1 %v4748_v33 }
0x1acb   :  { %v3718_v34 = vpop.permute.xlu0 %3717 }
0x1ad1   :  { %v5451_v27 = vpop.eup %5450 }
0x1ad2   :  { %v3399_v25 = vmul.f32 %v5451_v27, %v5447_v10 }
0x1ad4   :  { %5245 = vmatmul.mubr.msk.f32.vlgmr.msra.gmra.mxu1 %vm369_vm9, %v3399_v25 }
0x1ad5   :  { %5253 = vmatpush3.msra.mxu1 %v4748_v33 }
0x1ad6   :  { %5262 = vmatprep.subr.mxu1 %v5482_v14 }
0x1afc   :  { %v3550_v28 = vpop.f32.mrf.mxu0 }
0x1afe   :  { %v5251_v0 = vpop.f32.mrf.mxu0 }
0x1b00   :  { %v3711_v30 = vpop.f32.mrf.mxu0 }
0x1b01   :  { %v3712_v31 = vadd.f32 %v3711_v30, %v5702_v24  ;;  %v3716_v24 = vpop.permute.xlu0 %3715 }
0x1b02   :  { %v5261_v32 = vpop.f32.mrf.mxu0 }
0x1b03   :  { %v3793_v18 = vsel %vm369_vm9, %v3712_v31, -inf }
0x1b04   :  { %3794 = vmax.xlane.f32.xlu1 %v3793_v18 }
0x1b8d   :  { %v3795_v40 = vpop.xlane.xlu1 %3794 }
0x1b8e   :  { %v3799_v41 = vsub.f32 %v3712_v31, %v3795_v40  ;;  %v4806_v40 = vld [vmem:[%s6334_s7 + $0x20] sm:$0xff] }
0x1b90   :  { %v3801_v43 = vmul.f32 1.442695, %v3799_v41 }
0x1b92   :  { %5452 = vpow2.f32 %v3801_v43 }
0x1b94   :  { %v3474_v36 = vpop.f32.mrf.mxu1 }
0x1b95   :  { %5254 = vmatprep.mubr.msk.f32.mxu1 %vm369_vm9, %v3474_v36  ;;  %v4809_v36 = vld [vmem:[%s6334_s7 + $0x38] sm:$0xff] }
0x1b96   :  { %v5246_v37 = vpop.f32.mrf.mxu1  ;;  %5255 = vmatmul.mubr.msk.f32.vlgmr.msra.gmra.mxu1 %vm369_vm9, %v3550_v28 }
0x1b97   :  { %5263 = vmatpush3.xpose.msk.msra.mxu1 %vm369_vm9, %v3718_v34  ;;  %5264 = vmatprep.mubr.msk.f32.mxu1 %vm5483_vm8, %v5482_v14  ;;  %v4808_v37 = vld [vmem:[%s6334_s7 + $0x30] sm:$0xff] }
0x1b98   :  { %5272 = vmatprep.subr.mxu1 %v5482_v14 }
0x1b9a   :  { %5265 = vmatmul.mubr.msk.f32.vlgmr.msra.gmra.mxu1 %vm369_vm9, %v3716_v24  ;;  %v4807_v24 = vld [vmem:[%s6334_s7 + $0x28] sm:$0xff] }
0x1b9b   :  { %5274 = vmatprep.mubr.msk.f32.mxu1 %vm5483_vm8, %v5482_v14 }
0x1b9f   :  { %v5453_v55 = vpop.eup %5452 }
0x1ba0   :  { %v3805_v56 = vsel %vm369_vm9, %v5453_v55, 0.0 }
0x1c56   :  { %v5256_v46 = vpop.f32.mrf.mxu1 }
0x1c57   :  { %v3636_v12 = vadd.f32 %v5256_v46, %v3221_v45 }
0x1c58   :  { %v3626_v38 = vpop.f32.mrf.mxu1 }
0x1c59   :  { %v3635_v39 = vadd.f32 %v3626_v38, %v3216_v50  ;;  %v4805_v38 = vld [vmem:[%s6330_s5 + $0x6] sm:$0x3] }
0x1c5a   :  { %v3789_v51 = vpop.f32.mrf.mxu1 }
0x1c5b   :  { %v3790_v15 = vadd.f32 %v3789_v51, %v5705_v29  ;;  %v4089_v51 = vrot.slane %v4805_v38, %v5648_v48 }
0x1c5c   :  { %v5266_v53 = vpop.f32.mrf.mxu1 }
0x1c5d   :  { %v3796_v54 = vsel %vm369_vm9, %v3790_v15, -inf }
0x1c5e   :  { %3797 = vmax.xlane.f32.xlu0 %v3796_v54 }
0x1c62   :  { %3806 = vadd.xlane.f32.xlu0 %v3805_v56  ;;  %v4095_v56 = vrot.slane %v4805_v38, %v5655_v52 }
0x1c78   :  { %3815 = vrot.lane.b32.xlu0 %v5997_v26, %s5496_s29  ;;  %v4749_v26 = vld [vmem:[%s6333_s8 + $0xb8] sm:$0xff] }
0x1ce7   :  { %v3798_v49 = vpop.xlane.xlu0 %3797 }
0x1ce8   :  { %v3800_v57 = vsub.f32 %v3790_v15, %v3798_v49 }
0x1cea   :  { %v3803_v61 = vmul.f32 1.442695, %v3800_v57 }
0x1ceb   :  { %v3807_v58 = vpop.xlane.xlu0 %3806 }
0x1cec   :  { %5454 = vpow2.f32 %v3803_v61 }
0x1ced   :  { %5456 = vrcp.f32 %v3807_v58  ;;  %v4765_v58 = vld [vmem:[%s6333_s8 + $0x138] sm:$0xff] }
0x1cef   :  { %v3816_v3 = vpop.permute.xlu0 %3815 }
0x1cf0   :  { %5268 = vmatpush3.msra.mxu0 %v3816_v3  ;;  %v4764_v3 = vld [vmem:[%s6333_s8 + $0x130] sm:$0xff] }
0x1cf1   :  { %5277 = vmatprep.subr.mxu0 %v4749_v26 }
0x1cf9   :  { %v5455_v29 = vpop.eup %5454 }
0x1cfa   :  { %v5457_v59 = vpop.eup %5456  ;;  %v3808_v60 = vsel %vm369_vm9, %v5455_v29, 0.0 }
0x1cfb   :  { %3809 = vadd.xlane.f32.xlu1 %v3808_v60  ;;  %v3812_v62 = vmul.f32 %v5457_v59, %v5453_v55  ;;  %v4762_v59 = vld [vmem:[%s6333_s8 + $0x120] sm:$0xff]  ;;  %v4761_v60 = vld [vmem:[%s6333_s8 + $0x118] sm:$0xff] }
0x1cfd   :  { %5270 = vmatmul.mubr.msk.f32.vlgmr.msra.gmra.mxu0 %vm369_vm9, %v3812_v62  ;;  %v4760_v62 = vld [vmem:[%s6333_s8 + $0x110] sm:$0xff] }
0x1cfe   :  { %5278 = vmatpush3.msra.mxu0 %v4749_v26  ;;  %v4759_v26 = vld [vmem:[%s6333_s8 + $0x108] sm:$0xff] }
0x1cff   :  { %5293 = vmatprep.subr.mxu0 %v4765_v58 }
0x1d0c   :  { %3891 = vrot.lane.b32.xlu1 %v5995_v23, %s5496_s29 }
0x1d84   :  { %v3810_v63 = vpop.xlane.xlu1 %3809 }
0x1d85   :  { %5458 = vrcp.f32 %v3810_v63  ;;  %v4758_v63 = vld [vmem:[%s6333_s8 + $0x100] sm:$0xff] }
0x1d88   :  { %v3892_v2 = vpop.permute.xlu1 %3891 }
0x1d89   :  { %5273 = vmatpush3.msra.mxu1 %v3892_v2  ;;  %v4757_v2 = vld [vmem:[%s6333_s8 + $0xf8] sm:$0xff] }
0x1d8a   :  { %5282 = vmatprep.subr.mxu1 %v4809_v36 }
0x1d92   :  { %v5459_v4 = vpop.eup %5458 }
0x1d93   :  { %v3814_v5 = vmul.f32 %v5459_v4, %v5455_v29  ;;  %v4763_v29 = vld [vmem:[%s6333_s8 + $0x128] sm:$0xff]  ;;  %v4756_v4 = vld [vmem:[%s6333_s8 + $0xf0] sm:$0xff] }
0x1d95   :  { %5275 = vmatmul.mubr.msk.f32.vlgmr.msra.gmra.mxu1 %vm369_vm9, %v3814_v5  ;;  %v4755_v5 = vld [vmem:[%s6333_s8 + $0xe8] sm:$0xff] }
0x1d96   :  { %5283 = vmatpush3.msra.mxu1 %v4809_v36 }
0x1d97   :  { %5284 = vmatprep.subr.mxu1 %v4808_v37 }
0x1d98   :  { %5285 = vmatpush3.msra.mxu1 %v4808_v37 }
0x1d99   :  { %5286 = vmatprep.subr.mxu1 %v4807_v24 }
0x1d9a   :  { %5287 = vmatpush3.msra.mxu1 %v4807_v24 }
0x1d9b   :  { %5288 = vmatprep.subr.mxu1 %v4806_v40 }
0x1d9c   :  { %5289 = vmatpush3.msra.mxu1 %v4806_v40 }
0x1d9d   :  { %5328 = vmatprep.subr.mxu1 %v5482_v14 }
0x1dbd   :  { %v3887_v1 = vpop.f32.mrf.mxu0 }
0x1dbe   :  { %5279 = vmatprep.mubr.msk.f32.mxu0 %vm369_vm9, %v3887_v1  ;;  %v4754_v1 = vld [vmem:[%s6333_s8 + $0xe0] sm:$0xff] }
0x1dbf   :  { %v5271_v6 = vpop.f32.mrf.mxu0 }
0x1dc0   :  { %v4753_v6 = vld [vmem:[%s6333_s8 + $0xd8] sm:$0xff] }
0x1e55   :  { %v3963_v8 = vpop.f32.mrf.mxu1 }
0x1e56   :  { %5280 = vmatmul.mubr.msk.f32.vlgmr.msra.gmra.mxu0 %vm369_vm9, %v3963_v8  ;;  %v4752_v8 = vld [vmem:[%s6333_s8 + $0xd0] sm:$0xff] }
0x1e57   :  { %v5276_v23 = vpop.f32.mrf.mxu1  ;;  %5294 = vmatpush3.msra.mxu0 %v4765_v58  ;;  %v4329_v58 = vld [vmem:[%s6335_s10] sm:$0xff] }
0x1e58   :  { %5295 = vmatprep.subr.mxu0 %v4764_v3  ;;  %v4751_v23 = vld [vmem:[%s6333_s8 + $0xc8] sm:$0xff] }
0x1e59   :  { %5296 = vmatpush3.msra.mxu0 %v4764_v3 }
0x1e5a   :  { %5297 = vmatprep.subr.mxu0 %v4763_v29 }
0x1e5b   :  { %5298 = vmatpush3.msra.mxu0 %v4763_v29 }
0x1e5c   :  { %5299 = vmatprep.subr.mxu0 %v4762_v59 }
0x1e5d   :  { %5300 = vmatpush3.msra.mxu0 %v4762_v59 }
0x1e5e   :  { %5301 = vmatprep.subr.mxu0 %v4761_v60 }
0x1e5f   :  { %5302 = vmatpush3.msra.mxu0 %v4761_v60 }
0x1e60   :  { %5303 = vmatprep.subr.mxu0 %v4760_v62 }
0x1e61   :  { %5304 = vmatpush3.msra.mxu0 %v4760_v62 }
0x1e62   :  { %5305 = vmatprep.subr.mxu0 %v4759_v26 }
0x1e63   :  { %5306 = vmatpush3.msra.mxu0 %v4759_v26 }
0x1e64   :  { %5307 = vmatprep.subr.mxu0 %v4758_v63 }
0x1e65   :  { %5308 = vmatpush3.msra.mxu0 %v4758_v63  ;;  %v4812_v63 = vld [vmem:[%s6330_s5 + $0x8] sm:$0x3] }
0x1e66   :  { %5309 = vmatprep.subr.mxu0 %v4757_v2 }
0x1e67   :  { %5310 = vmatpush3.msra.mxu0 %v4757_v2  ;;  %v4320_v2 = vrot.slane %v4812_v63, %v5648_v48 }
0x1e68   :  { %5311 = vmatprep.subr.mxu0 %v4756_v4 }
0x1e69   :  { %5312 = vmatpush3.msra.mxu0 %v4756_v4 }
0x1e6a   :  { %5313 = vmatprep.subr.mxu0 %v4755_v5 }
0x1e6b   :  { %5314 = vmatpush3.msra.mxu0 %v4755_v5 }
0x1e6c   :  { %5315 = vmatprep.subr.mxu0 %v4754_v1 }
0x1e6d   :  { %5316 = vmatpush3.msra.mxu0 %v4754_v1  ;;  %v4326_v1 = vrot.slane %v4812_v63, %v5655_v52 }
0x1e6e   :  { %5317 = vmatprep.subr.mxu0 %v4753_v6 }
0x1e6f   :  { %5318 = vmatpush3.msra.mxu0 %v4753_v6 }
0x1e70   :  { %5319 = vmatprep.subr.mxu0 %v4752_v8 }
0x1e71   :  { %5320 = vmatpush3.msra.mxu0 %v4752_v8 }
0x1e72   :  { %5321 = vmatprep.subr.mxu0 %v4751_v23 }
0x1e73   :  { %5322 = vmatpush3.msra.mxu0 %v4751_v23 }
0x1f16   :  { %v5281_v9 = vpop.f32.mrf.mxu0 }
0x1f17   :  { %v4049_v10 = vadd.f32 %v5281_v9, %v3636_v12  ;;  %v4750_v9 = vld [vmem:[%s6333_s8 + $0xc0] sm:$0xff] }
0x1f18   :  { %v4039_v13 = vpop.f32.mrf.mxu0  ;;  %5323 = vmatprep.subr.mxu0 %v4750_v9 }
0x1f19   :  { %v4051_v16 = vadd.f32 %v4049_v10, %v5953_v42  ;;  %v4048_v17 = vadd.f32 %v4039_v13, %v3635_v39  ;;  %5324 = vmatpush3.msra.mxu0 %v4750_v9  ;;  %v4106_v10 = vrot.slane %v5991_v19, %v2067_v7 }
0x1f1b   :  { %v6170_v20 = vadd.f32 %v4055_v11, %v4051_v16  ;;  %v4050_v21 = vadd.f32 %v4048_v17, %v5956_v44 }
0x1f1d   :  { %v6173_v22 = vadd.f32 %v4055_v11, %v4050_v21  ;;  %v4063_v27 = vsel %vm237_vm7, %v6170_v20, 0.0 }
0x1f1e   :  { %4064 = vadd.xlane.f32.xlu0 %v4063_v27 }
0x1f1f   :  { %v4060_v25 = vsel %vm237_vm7, %v6173_v22, 0.0 }
0x1f20   :  { %4061 = vadd.xlane.f32.xlu1 %v4060_v25 }
0x1fa7   :  { %v4065_v28 = vpop.xlane.xlu0 %4064 }
0x1fa8   :  { %v4067_v0 = vmul.f32 0.03125, %v4065_v28 }
0x1fa9   :  { %v4062_v30 = vpop.xlane.xlu1 %4061 }
0x1faa   :  { %v4069_v42 = vsub.f32 %v6170_v20, %v4067_v0  ;;  %v4066_v31 = vmul.f32 0.03125, %v4062_v30 }
0x1fac   :  { %v4068_v32 = vsub.f32 %v6173_v22, %v4066_v31  ;;  %v4071_v18 = vmul.f32 %v4069_v42, %v4069_v42 }
0x1fae   :  { %v4075_v44 = vsel %vm237_vm7, %v4071_v18, 0.0  ;;  %v4070_v33 = vmul.f32 %v4068_v32, %v4068_v32 }
0x1faf   :  { %4076 = vadd.xlane.f32.xlu1 %v4075_v44 }
0x1fb0   :  { %v4072_v34 = vsel %vm237_vm7, %v4070_v33, 0.0 }
0x1fb1   :  { %4073 = vadd.xlane.f32.xlu0 %v4072_v34 }
0x2038   :  { %v4077_v41 = vpop.xlane.xlu1 %4076 }
0x2039   :  { %v4079_v43 = vmul.f32 0.03125, %v4077_v41  ;;  %v4286_v41 = vrot.slane %v5991_v19, %v2247_v35 }
0x203a   :  { %v4074_v45 = vpop.xlane.xlu0 %4073 }
0x203b   :  { %v4081_v46 = vadd.f32 1e-05, %v4079_v43  ;;  %v4078_v50 = vmul.f32 0.03125, %v4074_v45 }
0x203d   :  { %5460 = vrsqrt.f32 %v4081_v46  ;;  %v4080_v12 = vadd.f32 1e-05, %v4078_v50 }
0x203f   :  { %5462 = vrsqrt.f32 %v4080_v12 }
0x204a   :  { %v5461_v39 = vpop.eup %5460 }
0x204b   :  { %v4085_v15 = vmul.f32 %v5461_v39, %v4069_v42 }
0x204c   :  { %v5463_v53 = vpop.eup %5462 }
0x204d   :  { %v4084_v54 = vmul.f32 %v5463_v53, %v4068_v32  ;;  %v4091_v55 = vmul.f32 %v4089_v51, %v4085_v15 }
0x204f   :  { %v4090_v49 = vmul.f32 %v4089_v51, %v4084_v54  ;;  %v4097_v61 = vadd.f32 %v4095_v56, %v4091_v55 }
0x2051   :  { %v4096_v57 = vadd.f32 %v4095_v56, %v4090_v49  ;;  %v4332_v49 = vld [vmem:[%s6335_s10 + $0x18] sm:$0xff] }
0x2053   :  { %5290 = vmatprep.mubr.msk.f32.mxu1 %vm237_vm7, %v4096_v57  ;;  %v4331_v57 = vld [vmem:[%s6335_s10 + $0x10] sm:$0xff] }
0x2054   :  { %5291 = vmatmul.mubr.msk.f32.vlgmr.msra.gmra.mxu1 %vm237_vm7, %v4097_v61  ;;  %v4330_v61 = vld [vmem:[%s6335_s10 + $0x8] sm:$0xff] }
0x2055   :  { %5336 = vmatprep.mubr.msk.f32.mxu1 %vm5483_vm8, %v5482_v14  ;;  %5329 = vmatpush3.msra.mxu1 %v4332_v49 }
0x2056   :  { %5330 = vmatprep.subr.mxu1 %v5482_v14 }
0x2057   :  { %5331 = vmatpush3.msra.mxu1 %v4331_v57 }
0x2058   :  { %5332 = vmatprep.subr.mxu1 %v5482_v14 }
0x2059   :  { %5333 = vmatpush3.msra.mxu1 %v4330_v61 }
0x205a   :  { %5334 = vmatprep.subr.mxu1 %v5482_v14 }
0x205b   :  { %5335 = vmatpush3.msra.mxu1 %v4329_v58 }
0x205c   :  { %5339 = vmatprep.subr.mxu1 %v5482_v14 }
0x2114   :  { %v5292_v11 = vpop.f32.mrf.mxu1 }
0x2115   :  { %v4185_v13 = vadd.f32 %v5292_v11, %v4106_v10 }
0x2116   :  { %v4179_v16 = vpop.f32.mrf.mxu1 }
0x2117   :  { %v4189_v17 = vmul.f32 %v4185_v13, %v4185_v13  ;;  %v4180_v21 = vadd.f32 %v4179_v16, %v4106_v10 }
0x2119   :  { %v4191_v27 = vmul.f32 %v4189_v17, %v4185_v13  ;;  %v4188_v25 = vmul.f32 %v4180_v21, %v4180_v21  ;;  %v4334_v17 = vld [vmem:[%s6335_s10 + $0x28] sm:$0xff] }
0x211b   :  { %v4193_v28 = vmul.f32 0.044715, %v4191_v27  ;;  %v4190_v0 = vmul.f32 %v4188_v25, %v4180_v21  ;;  %v4333_v27 = vld [vmem:[%s6335_s10 + $0x20] sm:$0xff] }
0x211c   :  { %v4420_v25 = vld [vmem:[%s6336_s2] sm:$0x3] }
0x211d   :  { %v4195_v30 = vadd.f32 %v4193_v28, %v4185_v13  ;;  %v4192_v42 = vmul.f32 0.044715, %v4190_v0  ;;  %v4337_v28 = vld [vmem:[%s6337_s12 + $0x8] sm:$0xff]  ;;  %v4335_v0 = vld [vmem:[%s6338_s11] sm:$0x3] }
0x211f   :  { %v4197_v31 = vmul.f32 0.7978846, %v4195_v30  ;;  %v4194_v32 = vadd.f32 %v4192_v42, %v4180_v21  ;;  %v4424_v42 = vrot.slane %v4335_v0, %v5655_v52  ;;  %v19_v52 = vstv %s6339_s13 }
0x2120   :  { %20 = vst [vmem:[#allocation2] sm:$0x1] %v19_v52 }
0x2121   :  { %5464 = vtanh.f32 %v4197_v31  ;;  %v4196_v18 = vmul.f32 0.7978846, %v4194_v32 }
0x2123   :  { %5466 = vtanh.f32 %v4196_v18 }
0x212e   :  { %v5465_v44 = vpop.eup %5464 }
0x212f   :  { %v4201_v33 = vadd.f32 1.0, %v5465_v44 }
0x2130   :  { %v5467_v34 = vpop.eup %5466 }
0x2131   :  { %v4200_v7 = vadd.f32 1.0, %v5467_v34  ;;  %v4203_v36 = vmul.f32 0.5, %v4201_v33  ;;  %v4341_v33 = vrot.slane %v4335_v0, %v5648_v48 }
0x2133   :  { %v4202_v37 = vmul.f32 0.5, %v4200_v7  ;;  %v4205_v40 = vmul.f32 %v4203_v36, %v4185_v13  ;;  %v4336_v7 = vld [vmem:[%s6337_s12] sm:$0xff]  ;;  %s5497_s12 = smov 1  }
0x2135   :  { %v4204_v24 = vmul.f32 %v4202_v37, %v4180_v21 }
0x2137   :  { %5325 = vmatprep.mubr.f32.mxu0 %v4204_v24 }
0x2138   :  { %5326 = vmatmul.mubr.f32.vlgmr.msra.gmra.mxu0 %v4205_v40  ;;  %v4817_v40 = vld [vmem:[#allocation2] ss:$0 sm:$0xff] }
0x21f8   :  { %v5327_v43 = vpop.f32.mrf.mxu0 }
0x21f9   :  { %v4282_v45 = vadd.f32 %v5327_v43, %v6170_v20 }
0x21fa   :  { %v4272_v46 = vpop.f32.mrf.mxu0 }
0x21fb   :  { %v4281_v50 = vadd.f32 %v4272_v46, %v6173_v22  ;;  %v4288_v12 = vadd.f32 %v4286_v41, %v4282_v45 }
0x21fd   :  { %v4294_v38 = vsel %vm237_vm7, %v4288_v12, 0.0  ;;  %v4287_v39 = vadd.f32 %v4286_v41, %v4281_v50 }
0x21fe   :  { %4295 = vadd.xlane.f32.xlu1 %v4294_v38 }
0x21ff   :  { %v4291_v51 = vsel %vm237_vm7, %v4287_v39, 0.0 }
0x2200   :  { %4292 = vadd.xlane.f32.xlu0 %v4291_v51  ;;  %v4660_v51 = vld [vmem:[%s6340_s3] sm:$0x3] }
0x2287   :  { %v4296_v15 = vpop.xlane.xlu1 %4295 }
0x2288   :  { %v4298_v53 = vmul.f32 0.03125, %v4296_v15 }
0x2289   :  { %v4293_v54 = vpop.xlane.xlu0 %4292 }
0x228a   :  { %v4300_v47 = vsub.f32 %v4288_v12, %v4298_v53  ;;  %v4297_v55 = vmul.f32 0.03125, %v4293_v54 }
0x228c   :  { %v4299_v35 = vsub.f32 %v4287_v39, %v4297_v55  ;;  %v4302_v19 = vmul.f32 %v4300_v47, %v4300_v47  ;;  %v4669_v55 = vsub.f32 1.0, %v4660_v51 }
0x228e   :  { %v4306_v20 = vsel %vm237_vm7, %v4302_v19, 0.0  ;;  %v4301_v56 = vmul.f32 %v4299_v35, %v4299_v35 }
0x228f   :  { %4307 = vadd.xlane.f32.xlu1 %v4306_v20 }
0x2290   :  { %v4303_v22 = vsel %vm237_vm7, %v4301_v56, 0.0 }
0x2291   :  { %4304 = vadd.xlane.f32.xlu0 %v4303_v22 }
0x2318   :  { %v4308_v3 = vpop.xlane.xlu1 %4307 }
0x2319   :  { %v4310_v29 = vmul.f32 0.03125, %v4308_v3 }
0x231a   :  { %v4305_v59 = vpop.xlane.xlu0 %4304 }
0x231b   :  { %v4312_v60 = vadd.f32 1e-05, %v4310_v29  ;;  %v4309_v62 = vmul.f32 0.03125, %v4305_v59 }
0x231d   :  { %5468 = vrsqrt.f32 %v4312_v60  ;;  %v4311_v26 = vadd.f32 1e-05, %v4309_v62 }
0x231f   :  { %5470 = vrsqrt.f32 %v4311_v26 }
0x232a   :  { %v5469_v4 = vpop.eup %5468 }
0x232b   :  { %v4316_v5 = vmul.f32 %v5469_v4, %v4300_v47 }
0x232c   :  { %v5471_v6 = vpop.eup %5470 }
0x232d   :  { %v4315_v8 = vmul.f32 %v5471_v6, %v4299_v35  ;;  %v4322_v23 = vmul.f32 %v4320_v2, %v4316_v5 }
0x232f   :  { %v4321_v9 = vmul.f32 %v4320_v2, %v4315_v8  ;;  %v4328_v10 = vadd.f32 %v4326_v1, %v4322_v23 }
0x2331   :  { %v4327_v11 = vadd.f32 %v4326_v1, %v4321_v9  ;;  %v4345_v16 = vrot.slane %v4328_v10, 6 }
0x2333   :  { %v4344_v13 = vrot.slane %v4327_v11, 7 }
0x2335   :  { %v4347_v21 = vsel %vm4346_vm2, %v4345_v16, %v4344_v13 }
0x2336   :  { %5337 = vmatmul.mubr.msk.f32.vlgmr.msra.gmra.mxu1 %vm237_vm7, %v4347_v21  ;;  %vm4695_vm7 = vcmask 23552  }
0x2337   :  { %5340 = vmatpush3.msra.mxu1 %v4334_v17  ;;  %5343 = vmatprep.mubr.msk.f32.mxu1 %vm5483_vm8, %v5482_v14 }
0x2338   :  { %5341 = vmatprep.subr.mxu1 %v5482_v14 }
0x2339   :  { %5342 = vmatpush3.msra.mxu1 %v4333_v27 }
0x233a   :  { %5344 = vmatmul.mubr.msk.f32.vlgmr.msra.gmra.mxu1 %vm4425_vm3, %v4420_v25  ;;  %5346 = vmatprep.subr.mxu1 %v5482_v14 }
0x233b   :  { %5348 = vmatprep.mubr.msk.f32.mxu1 %vm5483_vm8, %v5482_v14  ;;  %5347 = vmatpush3.msra.mxu1 %v4337_v28 }
0x233c   :  { %5351 = vmatprep.subr.mxu1 %v5482_v14 }
0x23f6   :  { %v4416_v30 = vpop.f32.mrf.mxu1 }
0x23f7   :  { %v4417_v36 = vadd.f32 %v4416_v30, %v4341_v33 }
0x23f8   :  { %v5338_v31 = vpop.f32.mrf.mxu1 }
0x23fa   :  { %v4495_v32 = vpop.f32.mrf.mxu1 }
0x23fb   :  { %v4496_v18 = vadd.f32 %v4495_v32, %v4424_v42 }
0x23fc   :  { %v5345_v44 = vpop.f32.mrf.mxu1 }
0x23fd   :  { %v4499_v34 = vmax.f32 %v4496_v18, 0.0 }
0x23ff   :  { %5349 = vmatmul.mubr.msk.f32.vlgmr.msra.gmra.mxu1 %vm369_vm9, %v4499_v34 }
0x2400   :  { %5352 = vmatpush3.msra.mxu1 %v4336_v7  ;;  %5353 = vmatprep.mubr.msk.f32.mxu1 %vm5483_vm8, %v5482_v14  ;;  %vm4697_vm8 = vcmask 1041408  }
0x2403   :  { %5354 = vmatmul.mubr.msk.f32.vlgmr.msra.gmra.mxu1 %vm369_vm9, %v4417_v36 }
0x24bf   :  { %v4569_v48 = vpop.f32.mrf.mxu1 }
0x24c1   :  { %v5350_v37 = vpop.f32.mrf.mxu1 }
0x24c3   :  { %v4642_v24 = vpop.f32.mrf.mxu1 }
0x24c4   :  { %v4643_v41 = vadd.f32 %v4642_v24, %v4569_v48 }
0x24c5   :  { %v5355_v43 = vpop.f32.mrf.mxu1 }
0x24c6   :  { %v4653_v45 = vadd.f32 %v4817_v40, %v4643_v41 }
0x24c8   :  { %v4818_v46 = vmul.f32 -1.442695, %v4653_v45 }
0x24ca   :  { %5472 = vpow2.f32 %v4818_v46 }
0x24d7   :  { %v5473_v50 = vpop.eup %5472 }
0x24d8   :  { %v4657_v12 = vadd.f32 1.0, %v5473_v50 }
0x24da   :  { %5474 = vrcp.f32 %v4657_v12 }
0x24e7   :  { %v5475_v14 = vpop.eup %5474 }
0x24e8   :  { %4688 = vrot.lane.b32.xlu1 %v5475_v14, %s5497_s12  ;;  %5476 = vlog2.f32 %v5475_v14  ;;  %v4664_v38 = vsub.f32 1.0, %v5475_v14 }
0x24ea   :  { %5478 = vlog2.f32 %v4664_v38 }
0x24f5   :  { %v5477_v39 = vpop.eup %5476 }
0x24f6   :  { %v4662_v15 = vmul.f32 0.6931472, %v5477_v39 }
0x24f7   :  { %v5479_v53 = vpop.eup %5478 }
0x24f8   :  { %v4663_v54 = vmax.f32 %v4662_v15, -100.0  ;;  %v4666_v47 = vmul.f32 0.6931472, %v5479_v53 }
0x24fa   :  { %v4667_v35 = vmax.f32 %v4666_v47, -100.0  ;;  %v4668_v19 = vmul.f32 %v4663_v54, %v4660_v51 }
0x24fc   :  { %v4670_v20 = vmul.f32 %v4669_v55, %v4667_v35 }
0x24fe   :  { %v4671_v56 = vadd.f32 %v4670_v20, %v4668_v19 }
0x2500   :  { %v4672_v22 = vsub.f32 0.0, %v4671_v56 }
0x2502   :  { %v4674_v49 = vsel %vm4673_vm4, %v4672_v22, 0.0 }
0x2503   :  { %4675 = vadd.xlane.f32.xlu0 %v4674_v49 }
0x255a   :  { %v4689_v62 = vpop.permute.xlu1 %4688 }
0x255b   :  { %v4692_v2 = vsel %vm4691_vm5, %v4653_v45, %v4689_v62 }
0x258c   :  { %v4676_v57 = vpop.xlane.xlu0 %4675 }
0x258d   :  { %v4677_v61 = vrot.slane %v4676_v57, 4 }
0x258f   :  { %v4678_v58 = vadd.f32 %v4677_v61, %v4676_v57 }
0x2591   :  { %v4679_v3 = vrot.slane %v4678_v58, 2 }
0x2593   :  { %v4680_v29 = vadd.f32 %v4679_v3, %v4678_v58 }
0x2595   :  { %v4681_v59 = vrot.slane %v4680_v29, 1 }
0x2597   :  { %v4682_v60 = vadd.f32 %v4681_v59, %v4680_v29 }
0x2599   :  { %5356 = vpush %v4682_v60 }
0x25ca   :  { %s5357_s3 = spop %5356 }
0x25cb   :  { %v4684_v26 = vstv %s5357_s3 }
0x25cc   :  { %v4686_v63 = vmul.f32 0.5, %v4684_v26 }
0x25ce   :  { %v4694_v4 = vsel %vm4693_vm6, %v4692_v2, %v4686_v63 }
0x25cf   :  { %v4696_v5 = vsel %vm4695_vm7, %v4694_v4, 0.0 }
0x25d0   :  { %v4698_v1 = vsel %vm4697_vm8, %v4696_v5, 0.0 }
0x25d1   :  { %4699 = vst [vmem:[%s6341_s14] sm:$0xff] %v4698_v1 }

</bundles_post_ra>
